<compile_context>
chip_gen: v6e
topology: v6e:2x2x1
jax: 0.10.0
libtpu: 0.0.40
codegen_flags: <defaults>
</compile_context>

<pallas_src>
import functools

import jax
import jax.numpy as jnp
from jax.experimental import pallas as pl
from jax.experimental.pallas import tpu as pltpu


# Pad Cout to a multiple of 32 so the packed output lane dim (4*Cout_pad) is a
# multiple of 128 -> unmasked, lane-dense stores. MXU cost is unchanged.
LANE_BLOCK = 32


def _round_up(n, m):
    return ((n + m - 1) // m) * m


# ----------------------------------------------------------------------------
# Pallas kernels
# ----------------------------------------------------------------------------
def _deconv_act_kernel(x_ref, w_ref, b_ref, o_ref, *, activation, slope):
    """Fused sub-pixel transposed conv: matmul + bias + activation.

    x_ref: (M, K) bf16, w_ref: (K, 4*Cp) bf16, b_ref: (1, 4*Cp) f32.
    The 4 output parities live side by side in the lane dimension.
    """
    y = jnp.dot(x_ref[...], w_ref[...], preferred_element_type=jnp.float32)
    y = y + b_ref[...]
    if activation == "leaky_relu":
        y = jnp.where(y >= 0, y, slope * y)
    elif activation == "tanh":
        y = jnp.tanh(y)
    o_ref[...] = y.astype(o_ref.dtype)


def _deconv_bn_act_kernel(x_ref, w_ref, b_ref, g_ref, bt_ref, o_ref, *,
                          cout, eps, slope):
    """Fused sub-pixel transposed conv + BatchNorm(batch stats) + LeakyReLU.

    Conv output is (M, 4*Cp) with the 4 parities in lane blocks of width Cp;
    per-channel statistics reduce over the M rows AND the 4 blocks, which is
    exactly the NHWC batch statistic of the assembled output.
    """
    C = cout
    y = jnp.dot(x_ref[...], w_ref[...], preferred_element_type=jnp.float32)
    y = y + b_ref[...]
    M = y.shape[0]
    inv_cnt = 1.0 / (4.0 * M)

    s1 = jnp.sum(y, axis=0, keepdims=True)                          # (1, 4C)
    mean_c = (s1[:, 0:C] + s1[:, C:2 * C]
              + s1[:, 2 * C:3 * C] + s1[:, 3 * C:4 * C]) * inv_cnt   # (1, C)
    mean4 = jnp.concatenate([mean_c, mean_c, mean_c, mean_c], axis=1)
    d = y - mean4
    s2 = jnp.sum(d * d, axis=0, keepdims=True)
    var_c = (s2[:, 0:C] + s2[:, C:2 * C]
             + s2[:, 2 * C:3 * C] + s2[:, 3 * C:4 * C]) * inv_cnt
    scale_c = g_ref[...] * jax.lax.rsqrt(var_c + eps)                # (1, C)
    scale4 = jnp.concatenate([scale_c, scale_c, scale_c, scale_c], axis=1)
    shift4 = jnp.concatenate([bt_ref[...]] * 4, axis=1)
    yn = d * scale4 + shift4
    o_ref[...] = jnp.where(yn >= 0, yn, slope * yn).astype(o_ref.dtype)


# ----------------------------------------------------------------------------
# pallas_call wrapper: one launch, one grid step per layer
# ----------------------------------------------------------------------------
def _full_spec(shape):
    return pl.BlockSpec(shape, lambda i: (0,) * len(shape))


def fused_deconv_layer(x2d, w_merged, bias4, *, gamma=None, beta=None,
                       activation="leaky_relu", out_dtype=jnp.float32,
                       eps=1e-5, slope=0.01):
    """x2d: (M, K), w_merged: (K, 4*Cp) bf16, bias4: (1, 4*Cp) -> (M, 4*Cp)."""
    M, K = x2d.shape
    N4 = w_merged.shape[1]
    cpad = N4 // 4

    xb = x2d.astype(jnp.bfloat16)

    if gamma is None:
        kern = functools.partial(_deconv_act_kernel,
                                 activation=activation, slope=slope)
        in_specs = [_full_spec((M, K)), _full_spec((K, N4)),
                    _full_spec((1, N4))]
        args = (xb, w_merged, bias4)
    else:
        kern = functools.partial(_deconv_bn_act_kernel,
                                 cout=cpad, eps=eps, slope=slope)
        in_specs = [_full_spec((M, K)), _full_spec((K, N4)),
                    _full_spec((1, N4)), _full_spec((1, cpad)),
                    _full_spec((1, cpad))]
        args = (xb, w_merged, bias4, gamma, beta)

    return pl.pallas_call(
        kern,
        out_shape=jax.ShapeDtypeStruct((M, N4), out_dtype),
        grid=(1,),
        in_specs=in_specs,
        out_specs=_full_spec((M, N4)),
        compiler_params=pltpu.CompilerParams(
            dimension_semantics=("arbitrary",)),
    )(*args)


# ----------------------------------------------------------------------------
# Glue: merged weights / im2col / parity reassembly (plain JAX; no compute)
# ----------------------------------------------------------------------------
# ConvTranspose2d(k=4, s=2, p=1): oy = 2*iy - 1 + ky. Output parity a uses
# input rows iy = m + dy with tap ky given by:
_ROW_TAPS = {0: {0: 1, -1: 3}, 1: {1: 0, 0: 2}}        # parity -> {dy: ky}
_SHIFTS = [(dy, dx) for dy in (-1, 0, 1) for dx in (-1, 0, 1)]


def _merge_weight_k2s2(w, cpad):
    # w: (Cin, Cout, 2, 2) -> (Cin, 4*cpad); parity p = 2a + b uses tap (a, b).
    cout = w.shape[1]
    padw = cpad - cout
    blocks = [jnp.pad(w[:, :, a, b], ((0, 0), (0, padw)))
              for a in (0, 1) for b in (0, 1)]
    return jnp.concatenate(blocks, axis=1)


def _merge_weight_k4s2p1(w, cpad):
    # w: (Cin, Cout, 4, 4) -> (9*Cin, 4*cpad), block-structured over
    # (shift, parity); zero blocks where a parity does not use a shift.
    cin, cout = w.shape[0], w.shape[1]
    padw = cpad - cout
    zero = jnp.zeros((cin, cpad), w.dtype)
    rows = []
    for dy, dx in _SHIFTS:
        blocks = []
        for a in (0, 1):
            for b in (0, 1):
                if dy in _ROW_TAPS[a] and dx in _ROW_TAPS[b]:
                    blk = w[:, :, _ROW_TAPS[a][dy], _ROW_TAPS[b][dx]]
                    blocks.append(jnp.pad(blk, ((0, 0), (0, padw))))
                else:
                    blocks.append(zero)
        rows.append(jnp.concatenate(blocks, axis=1))    # (Cin, 4*cpad)
    return jnp.concatenate(rows, axis=0)                # (9*Cin, 4*cpad)


def _pad_bias4(b, cpad):
    padw = cpad - b.shape[0]
    return jnp.tile(jnp.pad(b.astype(jnp.float32), (0, padw)),
                    4).reshape(1, 4 * cpad)


def _pad_row(v, cpad):
    padw = cpad - v.shape[0]
    return jnp.pad(v.astype(jnp.float32), (0, padw)).reshape(1, cpad)


def _im2col_3x3(x_nhwc):
    # (N,H,W,C) -> (N*H*W, 9*C): zero-padded 3x3 neighborhoods, shift order
    # matching _merge_weight_k4s2p1.
    N, H, W, C = x_nhwc.shape
    xp = jnp.pad(x_nhwc, ((0, 0), (1, 1), (1, 1), (0, 0)))
    cols = [xp[:, 1 + dy:1 + dy + H, 1 + dx:1 + dx + W, :].reshape(N * H * W, C)
            for dy, dx in _SHIFTS]
    return jnp.concatenate(cols, axis=1)


def _assemble(y, N, H, W, cpad, cout):
    # y: (N*H*W, 4*cpad), parity p = 2a + b -> (N, 2H, 2W, cout)
    t = y.reshape(N, H, W, 2, 2, cpad)
    t = jnp.transpose(t, (0, 1, 3, 2, 4, 5))
    return t.reshape(N, 2 * H, 2 * W, cpad)[..., :cout]


# ----------------------------------------------------------------------------
# Generator forward (weight prep hoisted out of the per-call path)
# ----------------------------------------------------------------------------
def make_generator_forward(params, eps=1e-5, slope=0.01):
    """Pre-merges / pads / casts all weights once, returns a jitted forward."""
    def prep_k2(name):
        w, b = params[name]
        cout = int(w.shape[1])
        cpad = _round_up(cout, LANE_BLOCK)
        return dict(w=_merge_weight_k2s2(w, cpad).astype(jnp.bfloat16),
                    b=_pad_bias4(b, cpad), cout=cout, cpad=cpad)

    def prep_k4(name, bn=None):
        w, b = params[name]
        cout = int(w.shape[1])
        cpad = _round_up(cout, LANE_BLOCK)
        d = dict(w=_merge_weight_k4s2p1(w, cpad).astype(jnp.bfloat16),
                 b=_pad_bias4(b, cpad), cout=cout, cpad=cpad)
        if bn is not None:
            g, bt = params[bn]
            d["g"] = _pad_row(g, cpad)
            d["bt"] = _pad_row(bt, cpad)
        return d

    L1 = prep_k2("deconv1")
    LBN = [prep_k4("deconv2", "bn2"), prep_k4("deconv3", "bn3"),
           prep_k4("deconv4", "bn4")]
    L5 = prep_k4("deconv5")

    @jax.jit
    def forward(x_nchw):
        x = jnp.transpose(x_nchw, (0, 2, 3, 1)).astype(jnp.float32)   # -> NHWC
        N, H, W, _ = x.shape

        # deconv1 (k=2, s=2) + LeakyReLU
        y = fused_deconv_layer(x.reshape(N * H * W, -1), L1["w"], L1["b"],
                               activation="leaky_relu", slope=slope,
                               out_dtype=jnp.bfloat16)
        x = _assemble(y, N, H, W, L1["cpad"], L1["cout"])
        H, W = 2 * H, 2 * W

        # deconv2..4 (k=4, s=2, p=1) + BatchNorm(batch stats) + LeakyReLU
        for L in LBN:
            y = fused_deconv_layer(_im2col_3x3(x), L["w"], L["b"],
                                   gamma=L["g"], beta=L["bt"],
                                   eps=eps, slope=slope,
                                   out_dtype=jnp.bfloat16)
            x = _assemble(y, N, H, W, L["cpad"], L["cout"])
            H, W = 2 * H, 2 * W

        # deconv5 (k=4, s=2, p=1) + tanh
        y = fused_deconv_layer(_im2col_3x3(x), L5["w"], L5["b"],
                               activation="tanh", out_dtype=jnp.float32)
        x = _assemble(y, N, H, W, L5["cpad"], L5["cout"])
        return jnp.transpose(x, (0, 3, 1, 2))                         # -> NCHW

    return forward


def init_params(key, z=16, ch=8):
    ks = jax.random.split(key, 10)

    def conv_w(k, cin, cout, ksz):
        return 0.05 * jax.random.normal(k, (cin, cout, ksz, ksz), jnp.float32)

    def conv_b(k, cout):
        return 0.05 * jax.random.normal(k, (cout,), jnp.float32)

    return {
        "deconv1": (conv_w(ks[0], z, ch * 8, 2), conv_b(ks[1], ch * 8)),
        "deconv2": (conv_w(ks[2], ch * 8, ch * 4, 4), conv_b(ks[3], ch * 4)),
        "deconv3": (conv_w(ks[4], ch * 4, ch * 2, 4), conv_b(ks[5], ch * 2)),
        "deconv4": (conv_w(ks[6], ch * 2, ch, 4), conv_b(ks[7], ch)),
        "deconv5": (conv_w(ks[8], ch, 3, 4), conv_b(ks[9], 3)),
        # PyTorch BatchNorm2d default init: gamma=1, beta=0
        "bn2": (jnp.ones((ch * 4,), jnp.float32), jnp.zeros((ch * 4,), jnp.float32)),
        "bn3": (jnp.ones((ch * 2,), jnp.float32), jnp.zeros((ch * 2,), jnp.float32)),
        "bn4": (jnp.ones((ch,), jnp.float32), jnp.zeros((ch,), jnp.float32)),
    }


# ----------------------------------------------------------------------------
# Pure-JAX reference (f32) used only for a sanity check in __main__
# ----------------------------------------------------------------------------
def _ref_conv_transpose(x, w, b, stride, pad):
    N, H, W, _ = x.shape
    cout, k = w.shape[1], w.shape[2]
    full = jnp.zeros((N, (H - 1) * stride + k, (W - 1) * stride + k, cout),
                     jnp.float32)
    for ky in range(k):
        for kx in range(k):
            contrib = jnp.einsum("nhwc,cd->nhwd", x, w[:, :, ky, kx])
            full = full.at[:, ky:ky + (H - 1) * stride + 1:stride,
                              kx:kx + (W - 1) * stride + 1:stride, :].add(contrib)
    Ho = (H - 1) * stride + k - 2 * pad
    Wo = (W - 1) * stride + k - 2 * pad
    return full[:, pad:pad + Ho, pad:pad + Wo, :] + b


def _ref_bn_lrelu(x, g, bt, eps=1e-5, slope=0.01):
    mean = jnp.mean(x, axis=(0, 1, 2), keepdims=True)
    var = jnp.mean((x - mean) ** 2, axis=(0, 1, 2), keepdims=True)
    y = (x - mean) * jax.lax.rsqrt(var + eps) * g + bt
    return jnp.where(y >= 0, y, slope * y)


def _ref_generator(x_nchw, params):
    x = jnp.transpose(x_nchw, (0, 2, 3, 1)).astype(jnp.float32)
    w, b = params["deconv1"]
    x = _ref_conv_transpose(x, w, b, 2, 0)
    x = jnp.where(x >= 0, x, 0.01 * x)
    for name, bn in (("deconv2", "bn2"), ("deconv3", "bn3"), ("deconv4", "bn4")):
        w, b = params[name]
        g, bt = params[bn]
        x = _ref_bn_lrelu(_ref_conv_transpose(x, w, b, 2, 1), g, bt)
    w, b = params["deconv5"]
    x = jnp.tanh(_ref_conv_transpose(x, w, b, 2, 1))
    return jnp.transpose(x, (0, 3, 1, 2))


if __name__ == "__main__":
    key = jax.random.PRNGKey(0)
    kp, kx = jax.random.split(key)
    z, ch = 16, 8
    params = init_params(kp, z=z, ch=ch)
    # PyTorch-style NCHW latent: (batch=2, z=16, 1, 1) -> output (2, 3, 32, 32)
    x = jax.random.normal(kx, (2, z, 1, 1), jnp.float32)
    forward = make_generator_forward(params)
    out = forward(x)
    jax.block_until_ready(out)
    assert out.shape == (2, 3, 32, 32), out.shape
    assert bool(jnp.all(jnp.isfinite(out)))
    ref = _ref_generator(x, params)
    err = float(jnp.max(jnp.abs(out - ref)))
    assert err < 0.1, f"max abs err vs reference: {err}"
    print("KERNEL_OK")
</pallas_src>

<mosaic_0001>
module attributes {stable_mosaic.version = 11 : i64} {
  func.func @_deconv_act_kernel(%arg0: i32, %arg1: memref<2x16xbf16, #tpu.memory_space<vmem>>, %arg2: memref<16x256xbf16, #tpu.memory_space<vmem>>, %arg3: memref<1x256xf32, #tpu.memory_space<vmem>>, %arg4: memref<2x256xbf16, #tpu.memory_space<vmem>>) attributes {dimension_semantics = [#tpu.dimension_semantics<arbitrary>], iteration_bounds = array<i64: 1>, scalar_prefetch = 0 : i64, scratch_operands = 0 : i64, tpu.core_type = #tpu.core_type<tc>, window_params = [{pipeline_mode = #tpu.pipeline_mode<synchronous>, transform_indices = @transform_0, window_bounds = array<i64: 2, 16>}, {pipeline_mode = #tpu.pipeline_mode<synchronous>, transform_indices = @transform_1, window_bounds = array<i64: 16, 256>}, {pipeline_mode = #tpu.pipeline_mode<synchronous>, transform_indices = @transform_2, window_bounds = array<i64: 1, 256>}, {pipeline_mode = #tpu.pipeline_mode<synchronous>, transform_indices = @transform_3, window_bounds = array<i64: 2, 256>}]} {
    %c0 = arith.constant 0 : index
    %c0_0 = arith.constant 0 : index
    %0 = vector.load %arg1[%c0, %c0_0] : memref<2x16xbf16, #tpu.memory_space<vmem>>, vector<2x16xbf16>
    %c0_1 = arith.constant 0 : index
    %c0_2 = arith.constant 0 : index
    %1 = vector.load %arg2[%c0_1, %c0_2] : memref<16x256xbf16, #tpu.memory_space<vmem>>, vector<16x256xbf16>
    %cst = arith.constant dense<0.000000e+00> : vector<2x256xf32>
    %2 = tpu.matmul %0, %1, %cst {dimension_numbers = #tpu.dot_dimension_numbers<[1], [0], [0], [1], [0, 0, 1, 1], [], []>} : vector<2x16xbf16>, vector<16x256xbf16>, vector<2x256xf32> -> vector<2x256xf32>
    %c0_3 = arith.constant 0 : index
    %c0_4 = arith.constant 0 : index
    %3 = vector.load %arg3[%c0_3, %c0_4] : memref<1x256xf32, #tpu.memory_space<vmem>>, vector<1x256xf32>
    %4 = vector.broadcast %3 : vector<1x256xf32> to vector<2x256xf32>
    %5 = arith.addf %2, %4 : vector<2x256xf32>
    %cst_5 = arith.constant 0.000000e+00 : f32
    %6 = vector.broadcast %cst_5 : f32 to vector<2x256xf32>
    %7 = arith.cmpf oge, %5, %6 : vector<2x256xf32>
    %cst_6 = arith.constant 0.00999999977 : f32
    %8 = vector.broadcast %cst_6 : f32 to vector<2x256xf32>
    %9 = arith.mulf %8, %5 : vector<2x256xf32>
    %10 = arith.select %7, %5, %9 : vector<2x256xi1>, vector<2x256xf32>
    %11 = arith.truncf %10 : vector<2x256xf32> to vector<2x256xbf16>
    %c0_7 = arith.constant 0 : index
    %c0_8 = arith.constant 0 : index
    %12 = vector.load %arg4[%c0_7, %c0_8] : memref<2x256xbf16, #tpu.memory_space<vmem>>, vector<2x256xbf16>
    tpu.vector_store %arg4[%c0_7, %c0_8], %11 {strides = array<i32>} : memref<2x256xbf16, #tpu.memory_space<vmem>>, vector<2x256xbf16>,
    return
  }
  func.func @transform_0(%arg0: i32) -> (i32, i32) {
    %c0_i32 = arith.constant 0 : i32
    %c0_i32_0 = arith.constant 0 : i32
    %c0_i32_1 = arith.constant 0 : i32
    return %c0_i32, %c0_i32_0 : i32, i32
  }
  func.func @transform_1(%arg0: i32) -> (i32, i32) {
    %c0_i32 = arith.constant 0 : i32
    %c0_i32_0 = arith.constant 0 : i32
    %c0_i32_1 = arith.constant 0 : i32
    return %c0_i32, %c0_i32_0 : i32, i32
  }
  func.func @transform_2(%arg0: i32) -> (i32, i32) {
    %c0_i32 = arith.constant 0 : i32
    %c0_i32_0 = arith.constant 0 : i32
    %c0_i32_1 = arith.constant 0 : i32
    return %c0_i32, %c0_i32_0 : i32, i32
  }
  func.func @transform_3(%arg0: i32) -> (i32, i32) {
    %c0_i32 = arith.constant 0 : i32
    %c0_i32_0 = arith.constant 0 : i32
    %c0_i32_1 = arith.constant 0 : i32
    return %c0_i32, %c0_i32_0 : i32, i32
  }
}

module attributes {stable_mosaic.version = 11 : i64} {
  func.func @_deconv_bn_act_kernel(%arg0: i32, %arg1: memref<8x576xbf16, #tpu.memory_space<vmem>>, %arg2: memref<576x128xbf16, #tpu.memory_space<vmem>>, %arg3: memref<1x128xf32, #tpu.memory_space<vmem>>, %arg4: memref<1x32xf32, #tpu.memory_space<vmem>>, %arg5: memref<1x32xf32, #tpu.memory_space<vmem>>, %arg6: memref<8x128xbf16, #tpu.memory_space<vmem>>) attributes {dimension_semantics = [#tpu.dimension_semantics<arbitrary>], iteration_bounds = array<i64: 1>, scalar_prefetch = 0 : i64, scratch_operands = 0 : i64, tpu.core_type = #tpu.core_type<tc>, window_params = [{pipeline_mode = #tpu.pipeline_mode<synchronous>, transform_indices = @transform_0, window_bounds = array<i64: 8, 576>}, {pipeline_mode = #tpu.pipeline_mode<synchronous>, transform_indices = @transform_1, window_bounds = array<i64: 576, 128>}, {pipeline_mode = #tpu.pipeline_mode<synchronous>, transform_indices = @transform_2, window_bounds = array<i64: 1, 128>}, {pipeline_mode = #tpu.pipeline_mode<synchronous>, transform_indices = @transform_3, window_bounds = array<i64: 1, 32>}, {pipeline_mode = #tpu.pipeline_mode<synchronous>, transform_indices = @transform_4, window_bounds = array<i64: 1, 32>}, {pipeline_mode = #tpu.pipeline_mode<synchronous>, transform_indices = @transform_5, window_bounds = array<i64: 8, 128>}]} {
    %c0 = arith.constant 0 : index
    %c0_0 = arith.constant 0 : index
    %0 = vector.load %arg1[%c0, %c0_0] : memref<8x576xbf16, #tpu.memory_space<vmem>>, vector<8x576xbf16>
    %c0_1 = arith.constant 0 : index
    %c0_2 = arith.constant 0 : index
    %1 = vector.load %arg2[%c0_1, %c0_2] : memref<576x128xbf16, #tpu.memory_space<vmem>>, vector<576x128xbf16>
    %cst = arith.constant dense<0.000000e+00> : vector<8x128xf32>
    %2 = tpu.matmul %0, %1, %cst {dimension_numbers = #tpu.dot_dimension_numbers<[1], [0], [0], [1], [0, 0, 1, 1], [], []>} : vector<8x576xbf16>, vector<576x128xbf16>, vector<8x128xf32> -> vector<8x128xf32>
    %c0_3 = arith.constant 0 : index
    %c0_4 = arith.constant 0 : index
    %3 = vector.load %arg3[%c0_3, %c0_4] : memref<1x128xf32, #tpu.memory_space<vmem>>, vector<1x128xf32>
    %4 = vector.broadcast %3 : vector<1x128xf32> to vector<8x128xf32>
    %5 = arith.addf %2, %4 : vector<8x128xf32>
    %cst_5 = arith.constant dense<0.000000e+00> : vector<128xf32>
    %6 = vector.multi_reduction <add>, %5, %cst_5 [0] : vector<8x128xf32> to vector<128xf32>
    %7 = vector.shape_cast %6 : vector<128xf32> to vector<1x128xf32>
    %8 = vector.extract_strided_slice %7 {offsets = [0, 0], sizes = [1, 32], strides = [1, 1]} : vector<1x128xf32> to vector<1x32xf32>
    %9 = vector.extract_strided_slice %7 {offsets = [0, 32], sizes = [1, 32], strides = [1, 1]} : vector<1x128xf32> to vector<1x32xf32>
    %10 = arith.addf %8, %9 : vector<1x32xf32>
    %11 = vector.extract_strided_slice %7 {offsets = [0, 64], sizes = [1, 32], strides = [1, 1]} : vector<1x128xf32> to vector<1x32xf32>
    %12 = arith.addf %10, %11 : vector<1x32xf32>
    %13 = vector.extract_strided_slice %7 {offsets = [0, 96], sizes = [1, 32], strides = [1, 1]} : vector<1x128xf32> to vector<1x32xf32>
    %14 = arith.addf %12, %13 : vector<1x32xf32>
    %cst_6 = arith.constant 3.125000e-02 : f32
    %15 = vector.broadcast %cst_6 : f32 to vector<1x32xf32>
    %16 = arith.mulf %14, %15 : vector<1x32xf32>
    %17 = tpu.concatenate %16, %16, %16, %16 in 1 : vector<1x32xf32>, vector<1x32xf32>, vector<1x32xf32>, vector<1x32xf32> -> vector<1x128xf32>
    %18 = vector.broadcast %17 : vector<1x128xf32> to vector<8x128xf32>
    %19 = arith.subf %5, %18 : vector<8x128xf32>
    %20 = arith.mulf %19, %19 : vector<8x128xf32>
    %cst_7 = arith.constant dense<0.000000e+00> : vector<128xf32>
    %21 = vector.multi_reduction <add>, %20, %cst_7 [0] : vector<8x128xf32> to vector<128xf32>
    %22 = vector.shape_cast %21 : vector<128xf32> to vector<1x128xf32>
    %23 = vector.extract_strided_slice %22 {offsets = [0, 0], sizes = [1, 32], strides = [1, 1]} : vector<1x128xf32> to vector<1x32xf32>
    %24 = vector.extract_strided_slice %22 {offsets = [0, 32], sizes = [1, 32], strides = [1, 1]} : vector<1x128xf32> to vector<1x32xf32>
    %25 = arith.addf %23, %24 : vector<1x32xf32>
    %26 = vector.extract_strided_slice %22 {offsets = [0, 64], sizes = [1, 32], strides = [1, 1]} : vector<1x128xf32> to vector<1x32xf32>
    %27 = arith.addf %25, %26 : vector<1x32xf32>
    %28 = vector.extract_strided_slice %22 {offsets = [0, 96], sizes = [1, 32], strides = [1, 1]} : vector<1x128xf32> to vector<1x32xf32>
    %29 = arith.addf %27, %28 : vector<1x32xf32>
    %cst_8 = arith.constant 3.125000e-02 : f32
    %30 = vector.broadcast %cst_8 : f32 to vector<1x32xf32>
    %31 = arith.mulf %29, %30 : vector<1x32xf32>
    %c0_9 = arith.constant 0 : index
    %c0_10 = arith.constant 0 : index
    %32 = vector.load %arg4[%c0_9, %c0_10] : memref<1x32xf32, #tpu.memory_space<vmem>>, vector<1x32xf32>
    %cst_11 = arith.constant 9.99999974E-6 : f32
    %33 = vector.broadcast %cst_11 : f32 to vector<1x32xf32>
    %34 = arith.addf %31, %33 : vector<1x32xf32>
    %35 = math.rsqrt %34 : vector<1x32xf32>
    %36 = arith.mulf %32, %35 : vector<1x32xf32>
    %37 = tpu.concatenate %36, %36, %36, %36 in 1 : vector<1x32xf32>, vector<1x32xf32>, vector<1x32xf32>, vector<1x32xf32> -> vector<1x128xf32>
    %c0_12 = arith.constant 0 : index
    %c0_13 = arith.constant 0 : index
    %38 = vector.load %arg5[%c0_12, %c0_13] : memref<1x32xf32, #tpu.memory_space<vmem>>, vector<1x32xf32>
    %39 = tpu.concatenate %38, %38, %38, %38 in 1 : vector<1x32xf32>, vector<1x32xf32>, vector<1x32xf32>, vector<1x32xf32> -> vector<1x128xf32>
    %40 = vector.broadcast %37 : vector<1x128xf32> to vector<8x128xf32>
    %41 = arith.mulf %19, %40 : vector<8x128xf32>
    %42 = vector.broadcast %39 : vector<1x128xf32> to vector<8x128xf32>
    %43 = arith.addf %41, %42 : vector<8x128xf32>
    %cst_14 = arith.constant 0.000000e+00 : f32
    %44 = vector.broadcast %cst_14 : f32 to vector<8x128xf32>
    %45 = arith.cmpf oge, %43, %44 : vector<8x128xf32>
    %cst_15 = arith.constant 0.00999999977 : f32
    %46 = vector.broadcast %cst_15 : f32 to vector<8x128xf32>
    %47 = arith.mulf %46, %43 : vector<8x128xf32>
    %48 = arith.select %45, %43, %47 : vector<8x128xi1>, vector<8x128xf32>
    %49 = arith.truncf %48 : vector<8x128xf32> to vector<8x128xbf16>
    %c0_16 = arith.constant 0 : index
    %c0_17 = arith.constant 0 : index
    %50 = vector.load %arg6[%c0_16, %c0_17] : memref<8x128xbf16, #tpu.memory_space<vmem>>, vector<8x128xbf16>
    tpu.vector_store %arg6[%c0_16, %c0_17], %49 {strides = array<i32>} : memref<8x128xbf16, #tpu.memory_space<vmem>>, vector<8x128xbf16>,
    return
  }
  func.func @transform_0(%arg0: i32) -> (i32, i32) {
    %c0_i32 = arith.constant 0 : i32
    %c0_i32_0 = arith.constant 0 : i32
    %c0_i32_1 = arith.constant 0 : i32
    return %c0_i32, %c0_i32_0 : i32, i32
  }
  func.func @transform_1(%arg0: i32) -> (i32, i32) {
    %c0_i32 = arith.constant 0 : i32
    %c0_i32_0 = arith.constant 0 : i32
    %c0_i32_1 = arith.constant 0 : i32
    return %c0_i32, %c0_i32_0 : i32, i32
  }
  func.func @transform_2(%arg0: i32) -> (i32, i32) {
    %c0_i32 = arith.constant 0 : i32
    %c0_i32_0 = arith.constant 0 : i32
    %c0_i32_1 = arith.constant 0 : i32
    return %c0_i32, %c0_i32_0 : i32, i32
  }
  func.func @transform_3(%arg0: i32) -> (i32, i32) {
    %c0_i32 = arith.constant 0 : i32
    %c0_i32_0 = arith.constant 0 : i32
    %c0_i32_1 = arith.constant 0 : i32
    return %c0_i32, %c0_i32_0 : i32, i32
  }
  func.func @transform_4(%arg0: i32) -> (i32, i32) {
    %c0_i32 = arith.constant 0 : i32
    %c0_i32_0 = arith.constant 0 : i32
    %c0_i32_1 = arith.constant 0 : i32
    return %c0_i32, %c0_i32_0 : i32, i32
  }
  func.func @transform_5(%arg0: i32) -> (i32, i32) {
    %c0_i32 = arith.constant 0 : i32
    %c0_i32_0 = arith.constant 0 : i32
    %c0_i32_1 = arith.constant 0 : i32
    return %c0_i32, %c0_i32_0 : i32, i32
  }
}

module attributes {stable_mosaic.version = 11 : i64} {
  func.func @_deconv_bn_act_kernel(%arg0: i32, %arg1: memref<32x288xbf16, #tpu.memory_space<vmem>>, %arg2: memref<288x128xbf16, #tpu.memory_space<vmem>>, %arg3: memref<1x128xf32, #tpu.memory_space<vmem>>, %arg4: memref<1x32xf32, #tpu.memory_space<vmem>>, %arg5: memref<1x32xf32, #tpu.memory_space<vmem>>, %arg6: memref<32x128xbf16, #tpu.memory_space<vmem>>) attributes {dimension_semantics = [#tpu.dimension_semantics<arbitrary>], iteration_bounds = array<i64: 1>, scalar_prefetch = 0 : i64, scratch_operands = 0 : i64, tpu.core_type = #tpu.core_type<tc>, window_params = [{pipeline_mode = #tpu.pipeline_mode<synchronous>, transform_indices = @transform_0, window_bounds = array<i64: 32, 288>}, {pipeline_mode = #tpu.pipeline_mode<synchronous>, transform_indices = @transform_1, window_bounds = array<i64: 288, 128>}, {pipeline_mode = #tpu.pipeline_mode<synchronous>, transform_indices = @transform_2, window_bounds = array<i64: 1, 128>}, {pipeline_mode = #tpu.pipeline_mode<synchronous>, transform_indices = @transform_3, window_bounds = array<i64: 1, 32>}, {pipeline_mode = #tpu.pipeline_mode<synchronous>, transform_indices = @transform_4, window_bounds = array<i64: 1, 32>}, {pipeline_mode = #tpu.pipeline_mode<synchronous>, transform_indices = @transform_5, window_bounds = array<i64: 32, 128>}]} {
    %c0 = arith.constant 0 : index
    %c0_0 = arith.constant 0 : index
    %0 = vector.load %arg1[%c0, %c0_0] : memref<32x288xbf16, #tpu.memory_space<vmem>>, vector<32x288xbf16>
    %c0_1 = arith.constant 0 : index
    %c0_2 = arith.constant 0 : index
    %1 = vector.load %arg2[%c0_1, %c0_2] : memref<288x128xbf16, #tpu.memory_space<vmem>>, vector<288x128xbf16>
    %cst = arith.constant dense<0.000000e+00> : vector<32x128xf32>
    %2 = tpu.matmul %0, %1, %cst {dimension_numbers = #tpu.dot_dimension_numbers<[1], [0], [0], [1], [0, 0, 1, 1], [], []>} : vector<32x288xbf16>, vector<288x128xbf16>, vector<32x128xf32> -> vector<32x128xf32>
    %c0_3 = arith.constant 0 : index
    %c0_4 = arith.constant 0 : index
    %3 = vector.load %arg3[%c0_3, %c0_4] : memref<1x128xf32, #tpu.memory_space<vmem>>, vector<1x128xf32>
    %4 = vector.broadcast %3 : vector<1x128xf32> to vector<32x128xf32>
    %5 = arith.addf %2, %4 : vector<32x128xf32>
    %cst_5 = arith.constant dense<0.000000e+00> : vector<128xf32>
    %6 = vector.multi_reduction <add>, %5, %cst_5 [0] : vector<32x128xf32> to vector<128xf32>
    %7 = vector.shape_cast %6 : vector<128xf32> to vector<1x128xf32>
    %8 = vector.extract_strided_slice %7 {offsets = [0, 0], sizes = [1, 32], strides = [1, 1]} : vector<1x128xf32> to vector<1x32xf32>
    %9 = vector.extract_strided_slice %7 {offsets = [0, 32], sizes = [1, 32], strides = [1, 1]} : vector<1x128xf32> to vector<1x32xf32>
    %10 = arith.addf %8, %9 : vector<1x32xf32>
    %11 = vector.extract_strided_slice %7 {offsets = [0, 64], sizes = [1, 32], strides = [1, 1]} : vector<1x128xf32> to vector<1x32xf32>
    %12 = arith.addf %10, %11 : vector<1x32xf32>
    %13 = vector.extract_strided_slice %7 {offsets = [0, 96], sizes = [1, 32], strides = [1, 1]} : vector<1x128xf32> to vector<1x32xf32>
    %14 = arith.addf %12, %13 : vector<1x32xf32>
    %cst_6 = arith.constant 7.812500e-03 : f32
    %15 = vector.broadcast %cst_6 : f32 to vector<1x32xf32>
    %16 = arith.mulf %14, %15 : vector<1x32xf32>
    %17 = tpu.concatenate %16, %16, %16, %16 in 1 : vector<1x32xf32>, vector<1x32xf32>, vector<1x32xf32>, vector<1x32xf32> -> vector<1x128xf32>
    %18 = vector.broadcast %17 : vector<1x128xf32> to vector<32x128xf32>
    %19 = arith.subf %5, %18 : vector<32x128xf32>
    %20 = arith.mulf %19, %19 : vector<32x128xf32>
    %cst_7 = arith.constant dense<0.000000e+00> : vector<128xf32>
    %21 = vector.multi_reduction <add>, %20, %cst_7 [0] : vector<32x128xf32> to vector<128xf32>
    %22 = vector.shape_cast %21 : vector<128xf32> to vector<1x128xf32>
    %23 = vector.extract_strided_slice %22 {offsets = [0, 0], sizes = [1, 32], strides = [1, 1]} : vector<1x128xf32> to vector<1x32xf32>
    %24 = vector.extract_strided_slice %22 {offsets = [0, 32], sizes = [1, 32], strides = [1, 1]} : vector<1x128xf32> to vector<1x32xf32>
    %25 = arith.addf %23, %24 : vector<1x32xf32>
    %26 = vector.extract_strided_slice %22 {offsets = [0, 64], sizes = [1, 32], strides = [1, 1]} : vector<1x128xf32> to vector<1x32xf32>
    %27 = arith.addf %25, %26 : vector<1x32xf32>
    %28 = vector.extract_strided_slice %22 {offsets = [0, 96], sizes = [1, 32], strides = [1, 1]} : vector<1x128xf32> to vector<1x32xf32>
    %29 = arith.addf %27, %28 : vector<1x32xf32>
    %cst_8 = arith.constant 7.812500e-03 : f32
    %30 = vector.broadcast %cst_8 : f32 to vector<1x32xf32>
    %31 = arith.mulf %29, %30 : vector<1x32xf32>
    %c0_9 = arith.constant 0 : index
    %c0_10 = arith.constant 0 : index
    %32 = vector.load %arg4[%c0_9, %c0_10] : memref<1x32xf32, #tpu.memory_space<vmem>>, vector<1x32xf32>
    %cst_11 = arith.constant 9.99999974E-6 : f32
    %33 = vector.broadcast %cst_11 : f32 to vector<1x32xf32>
    %34 = arith.addf %31, %33 : vector<1x32xf32>
    %35 = math.rsqrt %34 : vector<1x32xf32>
    %36 = arith.mulf %32, %35 : vector<1x32xf32>
    %37 = tpu.concatenate %36, %36, %36, %36 in 1 : vector<1x32xf32>, vector<1x32xf32>, vector<1x32xf32>, vector<1x32xf32> -> vector<1x128xf32>
    %c0_12 = arith.constant 0 : index
    %c0_13 = arith.constant 0 : index
    %38 = vector.load %arg5[%c0_12, %c0_13] : memref<1x32xf32, #tpu.memory_space<vmem>>, vector<1x32xf32>
    %39 = tpu.concatenate %38, %38, %38, %38 in 1 : vector<1x32xf32>, vector<1x32xf32>, vector<1x32xf32>, vector<1x32xf32> -> vector<1x128xf32>
    %40 = vector.broadcast %37 : vector<1x128xf32> to vector<32x128xf32>
    %41 = arith.mulf %19, %40 : vector<32x128xf32>
    %42 = vector.broadcast %39 : vector<1x128xf32> to vector<32x128xf32>
    %43 = arith.addf %41, %42 : vector<32x128xf32>
    %cst_14 = arith.constant 0.000000e+00 : f32
    %44 = vector.broadcast %cst_14 : f32 to vector<32x128xf32>
    %45 = arith.cmpf oge, %43, %44 : vector<32x128xf32>
    %cst_15 = arith.constant 0.00999999977 : f32
    %46 = vector.broadcast %cst_15 : f32 to vector<32x128xf32>
    %47 = arith.mulf %46, %43 : vector<32x128xf32>
    %48 = arith.select %45, %43, %47 : vector<32x128xi1>, vector<32x128xf32>
    %49 = arith.truncf %48 : vector<32x128xf32> to vector<32x128xbf16>
    %c0_16 = arith.constant 0 : index
    %c0_17 = arith.constant 0 : index
    %50 = vector.load %arg6[%c0_16, %c0_17] : memref<32x128xbf16, #tpu.memory_space<vmem>>, vector<32x128xbf16>
    tpu.vector_store %arg6[%c0_16, %c0_17], %49 {strides = array<i32>} : memref<32x128xbf16, #tpu.memory_space<vmem>>, vector<32x128xbf16>,
    return
  }
  func.func @transform_0(%arg0: i32) -> (i32, i32) {
    %c0_i32 = arith.constant 0 : i32
    %c0_i32_0 = arith.constant 0 : i32
    %c0_i32_1 = arith.constant 0 : i32
    return %c0_i32, %c0_i32_0 : i32, i32
  }
  func.func @transform_1(%arg0: i32) -> (i32, i32) {
    %c0_i32 = arith.constant 0 : i32
    %c0_i32_0 = arith.constant 0 : i32
    %c0_i32_1 = arith.constant 0 : i32
    return %c0_i32, %c0_i32_0 : i32, i32
  }
  func.func @transform_2(%arg0: i32) -> (i32, i32) {
    %c0_i32 = arith.constant 0 : i32
    %c0_i32_0 = arith.constant 0 : i32
    %c0_i32_1 = arith.constant 0 : i32
    return %c0_i32, %c0_i32_0 : i32, i32
  }
  func.func @transform_3(%arg0: i32) -> (i32, i32) {
    %c0_i32 = arith.constant 0 : i32
    %c0_i32_0 = arith.constant 0 : i32
    %c0_i32_1 = arith.constant 0 : i32
    return %c0_i32, %c0_i32_0 : i32, i32
  }
  func.func @transform_4(%arg0: i32) -> (i32, i32) {
    %c0_i32 = arith.constant 0 : i32
    %c0_i32_0 = arith.constant 0 : i32
    %c0_i32_1 = arith.constant 0 : i32
    return %c0_i32, %c0_i32_0 : i32, i32
  }
  func.func @transform_5(%arg0: i32) -> (i32, i32) {
    %c0_i32 = arith.constant 0 : i32
    %c0_i32_0 = arith.constant 0 : i32
    %c0_i32_1 = arith.constant 0 : i32
    return %c0_i32, %c0_i32_0 : i32, i32
  }
}

module attributes {stable_mosaic.version = 11 : i64} {
  func.func @_deconv_bn_act_kernel(%arg0: i32, %arg1: memref<128x144xbf16, #tpu.memory_space<vmem>>, %arg2: memref<144x128xbf16, #tpu.memory_space<vmem>>, %arg3: memref<1x128xf32, #tpu.memory_space<vmem>>, %arg4: memref<1x32xf32, #tpu.memory_space<vmem>>, %arg5: memref<1x32xf32, #tpu.memory_space<vmem>>, %arg6: memref<128x128xbf16, #tpu.memory_space<vmem>>) attributes {dimension_semantics = [#tpu.dimension_semantics<arbitrary>], iteration_bounds = array<i64: 1>, scalar_prefetch = 0 : i64, scratch_operands = 0 : i64, tpu.core_type = #tpu.core_type<tc>, window_params = [{pipeline_mode = #tpu.pipeline_mode<synchronous>, transform_indices = @transform_0, window_bounds = array<i64: 128, 144>}, {pipeline_mode = #tpu.pipeline_mode<synchronous>, transform_indices = @transform_1, window_bounds = array<i64: 144, 128>}, {pipeline_mode = #tpu.pipeline_mode<synchronous>, transform_indices = @transform_2, window_bounds = array<i64: 1, 128>}, {pipeline_mode = #tpu.pipeline_mode<synchronous>, transform_indices = @transform_3, window_bounds = array<i64: 1, 32>}, {pipeline_mode = #tpu.pipeline_mode<synchronous>, transform_indices = @transform_4, window_bounds = array<i64: 1, 32>}, {pipeline_mode = #tpu.pipeline_mode<synchronous>, transform_indices = @transform_5, window_bounds = array<i64: 128, 128>}]} {
    %c0 = arith.constant 0 : index
    %c0_0 = arith.constant 0 : index
    %0 = vector.load %arg1[%c0, %c0_0] : memref<128x144xbf16, #tpu.memory_space<vmem>>, vector<128x144xbf16>
    %c0_1 = arith.constant 0 : index
    %c0_2 = arith.constant 0 : index
    %1 = vector.load %arg2[%c0_1, %c0_2] : memref<144x128xbf16, #tpu.memory_space<vmem>>, vector<144x128xbf16>
    %cst = arith.constant dense<0.000000e+00> : vector<128x128xf32>
    %2 = tpu.matmul %0, %1, %cst {dimension_numbers = #tpu.dot_dimension_numbers<[1], [0], [0], [1], [0, 0, 1, 1], [], []>} : vector<128x144xbf16>, vector<144x128xbf16>, vector<128x128xf32> -> vector<128x128xf32>
    %c0_3 = arith.constant 0 : index
    %c0_4 = arith.constant 0 : index
    %3 = vector.load %arg3[%c0_3, %c0_4] : memref<1x128xf32, #tpu.memory_space<vmem>>, vector<1x128xf32>
    %4 = vector.broadcast %3 : vector<1x128xf32> to vector<128x128xf32>
    %5 = arith.addf %2, %4 : vector<128x128xf32>
    %cst_5 = arith.constant dense<0.000000e+00> : vector<128xf32>
    %6 = vector.multi_reduction <add>, %5, %cst_5 [0] : vector<128x128xf32> to vector<128xf32>
    %7 = vector.shape_cast %6 : vector<128xf32> to vector<1x128xf32>
    %8 = vector.extract_strided_slice %7 {offsets = [0, 0], sizes = [1, 32], strides = [1, 1]} : vector<1x128xf32> to vector<1x32xf32>
    %9 = vector.extract_strided_slice %7 {offsets = [0, 32], sizes = [1, 32], strides = [1, 1]} : vector<1x128xf32> to vector<1x32xf32>
    %10 = arith.addf %8, %9 : vector<1x32xf32>
    %11 = vector.extract_strided_slice %7 {offsets = [0, 64], sizes = [1, 32], strides = [1, 1]} : vector<1x128xf32> to vector<1x32xf32>
    %12 = arith.addf %10, %11 : vector<1x32xf32>
    %13 = vector.extract_strided_slice %7 {offsets = [0, 96], sizes = [1, 32], strides = [1, 1]} : vector<1x128xf32> to vector<1x32xf32>
    %14 = arith.addf %12, %13 : vector<1x32xf32>
    %cst_6 = arith.constant 0.001953125 : f32
    %15 = vector.broadcast %cst_6 : f32 to vector<1x32xf32>
    %16 = arith.mulf %14, %15 : vector<1x32xf32>
    %17 = tpu.concatenate %16, %16, %16, %16 in 1 : vector<1x32xf32>, vector<1x32xf32>, vector<1x32xf32>, vector<1x32xf32> -> vector<1x128xf32>
    %18 = vector.broadcast %17 : vector<1x128xf32> to vector<128x128xf32>
    %19 = arith.subf %5, %18 : vector<128x128xf32>
    %20 = arith.mulf %19, %19 : vector<128x128xf32>
    %cst_7 = arith.constant dense<0.000000e+00> : vector<128xf32>
    %21 = vector.multi_reduction <add>, %20, %cst_7 [0] : vector<128x128xf32> to vector<128xf32>
    %22 = vector.shape_cast %21 : vector<128xf32> to vector<1x128xf32>
    %23 = vector.extract_strided_slice %22 {offsets = [0, 0], sizes = [1, 32], strides = [1, 1]} : vector<1x128xf32> to vector<1x32xf32>
    %24 = vector.extract_strided_slice %22 {offsets = [0, 32], sizes = [1, 32], strides = [1, 1]} : vector<1x128xf32> to vector<1x32xf32>
    %25 = arith.addf %23, %24 : vector<1x32xf32>
    %26 = vector.extract_strided_slice %22 {offsets = [0, 64], sizes = [1, 32], strides = [1, 1]} : vector<1x128xf32> to vector<1x32xf32>
    %27 = arith.addf %25, %26 : vector<1x32xf32>
    %28 = vector.extract_strided_slice %22 {offsets = [0, 96], sizes = [1, 32], strides = [1, 1]} : vector<1x128xf32> to vector<1x32xf32>
    %29 = arith.addf %27, %28 : vector<1x32xf32>
    %cst_8 = arith.constant 0.001953125 : f32
    %30 = vector.broadcast %cst_8 : f32 to vector<1x32xf32>
    %31 = arith.mulf %29, %30 : vector<1x32xf32>
    %c0_9 = arith.constant 0 : index
    %c0_10 = arith.constant 0 : index
    %32 = vector.load %arg4[%c0_9, %c0_10] : memref<1x32xf32, #tpu.memory_space<vmem>>, vector<1x32xf32>
    %cst_11 = arith.constant 9.99999974E-6 : f32
    %33 = vector.broadcast %cst_11 : f32 to vector<1x32xf32>
    %34 = arith.addf %31, %33 : vector<1x32xf32>
    %35 = math.rsqrt %34 : vector<1x32xf32>
    %36 = arith.mulf %32, %35 : vector<1x32xf32>
    %37 = tpu.concatenate %36, %36, %36, %36 in 1 : vector<1x32xf32>, vector<1x32xf32>, vector<1x32xf32>, vector<1x32xf32> -> vector<1x128xf32>
    %c0_12 = arith.constant 0 : index
    %c0_13 = arith.constant 0 : index
    %38 = vector.load %arg5[%c0_12, %c0_13] : memref<1x32xf32, #tpu.memory_space<vmem>>, vector<1x32xf32>
    %39 = tpu.concatenate %38, %38, %38, %38 in 1 : vector<1x32xf32>, vector<1x32xf32>, vector<1x32xf32>, vector<1x32xf32> -> vector<1x128xf32>
    %40 = vector.broadcast %37 : vector<1x128xf32> to vector<128x128xf32>
    %41 = arith.mulf %19, %40 : vector<128x128xf32>
    %42 = vector.broadcast %39 : vector<1x128xf32> to vector<128x128xf32>
    %43 = arith.addf %41, %42 : vector<128x128xf32>
    %cst_14 = arith.constant 0.000000e+00 : f32
    %44 = vector.broadcast %cst_14 : f32 to vector<128x128xf32>
    %45 = arith.cmpf oge, %43, %44 : vector<128x128xf32>
    %cst_15 = arith.constant 0.00999999977 : f32
    %46 = vector.broadcast %cst_15 : f32 to vector<128x128xf32>
    %47 = arith.mulf %46, %43 : vector<128x128xf32>
    %48 = arith.select %45, %43, %47 : vector<128x128xi1>, vector<128x128xf32>
    %49 = arith.truncf %48 : vector<128x128xf32> to vector<128x128xbf16>
    %c0_16 = arith.constant 0 : index
    %c0_17 = arith.constant 0 : index
    %50 = vector.load %arg6[%c0_16, %c0_17] : memref<128x128xbf16, #tpu.memory_space<vmem>>, vector<128x128xbf16>
    tpu.vector_store %arg6[%c0_16, %c0_17], %49 {strides = array<i32>} : memref<128x128xbf16, #tpu.memory_space<vmem>>, vector<128x128xbf16>,
    return
  }
  func.func @transform_0(%arg0: i32) -> (i32, i32) {
    %c0_i32 = arith.constant 0 : i32
    %c0_i32_0 = arith.constant 0 : i32
    %c0_i32_1 = arith.constant 0 : i32
    return %c0_i32, %c0_i32_0 : i32, i32
  }
  func.func @transform_1(%arg0: i32) -> (i32, i32) {
    %c0_i32 = arith.constant 0 : i32
    %c0_i32_0 = arith.constant 0 : i32
    %c0_i32_1 = arith.constant 0 : i32
    return %c0_i32, %c0_i32_0 : i32, i32
  }
  func.func @transform_2(%arg0: i32) -> (i32, i32) {
    %c0_i32 = arith.constant 0 : i32
    %c0_i32_0 = arith.constant 0 : i32
    %c0_i32_1 = arith.constant 0 : i32
    return %c0_i32, %c0_i32_0 : i32, i32
  }
  func.func @transform_3(%arg0: i32) -> (i32, i32) {
    %c0_i32 = arith.constant 0 : i32
    %c0_i32_0 = arith.constant 0 : i32
    %c0_i32_1 = arith.constant 0 : i32
    return %c0_i32, %c0_i32_0 : i32, i32
  }
  func.func @transform_4(%arg0: i32) -> (i32, i32) {
    %c0_i32 = arith.constant 0 : i32
    %c0_i32_0 = arith.constant 0 : i32
    %c0_i32_1 = arith.constant 0 : i32
    return %c0_i32, %c0_i32_0 : i32, i32
  }
  func.func @transform_5(%arg0: i32) -> (i32, i32) {
    %c0_i32 = arith.constant 0 : i32
    %c0_i32_0 = arith.constant 0 : i32
    %c0_i32_1 = arith.constant 0 : i32
    return %c0_i32, %c0_i32_0 : i32, i32
  }
}

module attributes {stable_mosaic.version = 11 : i64} {
  func.func @_deconv_act_kernel(%arg0: i32, %arg1: memref<512x72xbf16, #tpu.memory_space<vmem>>, %arg2: memref<72x128xbf16, #tpu.memory_space<vmem>>, %arg3: memref<1x128xf32, #tpu.memory_space<vmem>>, %arg4: memref<512x128xf32, #tpu.memory_space<vmem>>) attributes {dimension_semantics = [#tpu.dimension_semantics<arbitrary>], iteration_bounds = array<i64: 1>, scalar_prefetch = 0 : i64, scratch_operands = 0 : i64, tpu.core_type = #tpu.core_type<tc>, window_params = [{pipeline_mode = #tpu.pipeline_mode<synchronous>, transform_indices = @transform_0, window_bounds = array<i64: 512, 72>}, {pipeline_mode = #tpu.pipeline_mode<synchronous>, transform_indices = @transform_1, window_bounds = array<i64: 72, 128>}, {pipeline_mode = #tpu.pipeline_mode<synchronous>, transform_indices = @transform_2, window_bounds = array<i64: 1, 128>}, {pipeline_mode = #tpu.pipeline_mode<synchronous>, transform_indices = @transform_3, window_bounds = array<i64: 512, 128>}]} {
    %c0 = arith.constant 0 : index
    %c0_0 = arith.constant 0 : index
    %0 = vector.load %arg1[%c0, %c0_0] : memref<512x72xbf16, #tpu.memory_space<vmem>>, vector<512x72xbf16>
    %c0_1 = arith.constant 0 : index
    %c0_2 = arith.constant 0 : index
    %1 = vector.load %arg2[%c0_1, %c0_2] : memref<72x128xbf16, #tpu.memory_space<vmem>>, vector<72x128xbf16>
    %cst = arith.constant dense<0.000000e+00> : vector<512x128xf32>
    %2 = tpu.matmul %0, %1, %cst {dimension_numbers = #tpu.dot_dimension_numbers<[1], [0], [0], [1], [0, 0, 1, 1], [], []>} : vector<512x72xbf16>, vector<72x128xbf16>, vector<512x128xf32> -> vector<512x128xf32>
    %c0_3 = arith.constant 0 : index
    %c0_4 = arith.constant 0 : index
    %3 = vector.load %arg3[%c0_3, %c0_4] : memref<1x128xf32, #tpu.memory_space<vmem>>, vector<1x128xf32>
    %4 = vector.broadcast %3 : vector<1x128xf32> to vector<512x128xf32>
    %5 = arith.addf %2, %4 : vector<512x128xf32>
    %6 = math.tanh %5 : vector<512x128xf32>
    %c0_5 = arith.constant 0 : index
    %c0_6 = arith.constant 0 : index
    %7 = vector.load %arg4[%c0_5, %c0_6] : memref<512x128xf32, #tpu.memory_space<vmem>>, vector<512x128xf32>
    tpu.vector_store %arg4[%c0_5, %c0_6], %6 {strides = array<i32>} : memref<512x128xf32, #tpu.memory_space<vmem>>, vector<512x128xf32>,
    return
  }
  func.func @transform_0(%arg0: i32) -> (i32, i32) {
    %c0_i32 = arith.constant 0 : i32
    %c0_i32_0 = arith.constant 0 : i32
    %c0_i32_1 = arith.constant 0 : i32
    return %c0_i32, %c0_i32_0 : i32, i32
  }
  func.func @transform_1(%arg0: i32) -> (i32, i32) {
    %c0_i32 = arith.constant 0 : i32
    %c0_i32_0 = arith.constant 0 : i32
    %c0_i32_1 = arith.constant 0 : i32
    return %c0_i32, %c0_i32_0 : i32, i32
  }
  func.func @transform_2(%arg0: i32) -> (i32, i32) {
    %c0_i32 = arith.constant 0 : i32
    %c0_i32_0 = arith.constant 0 : i32
    %c0_i32_1 = arith.constant 0 : i32
    return %c0_i32, %c0_i32_0 : i32, i32
  }
  func.func @transform_3(%arg0: i32) -> (i32, i32) {
    %c0_i32 = arith.constant 0 : i32
    %c0_i32_0 = arith.constant 0 : i32
    %c0_i32_1 = arith.constant 0 : i32
    return %c0_i32, %c0_i32_0 : i32, i32
  }
}

</mosaic_0001>

<bundles_post_ra>
// kernel: forward.5
= control target key start
LH: loop header
LB: loop body
LE: loop exit
PB: predicated region body
PF: predicated region fallthrough
CT: control target
= control target key end

     0   :  { %v126_v1 = vmov 0   ;;  %vm40_vm0 = vcmask 130048   ;;  %v20_v4 = vlaneseq  ;;  %v127_v10 = vmov 1966171168   ;;  %s163_s1 = inlined_call_operand.vmem [shape: bf16[16,256], index: 1, kind: input, shape index: {}]   ;;  %s164_s0 = inlined_call_operand.vmem [shape: bf16[2,16], index: 0, kind: input, shape index: {}]   ;;  %s165_s2 = inlined_call_operand.vmem [shape: f32[1,256], index: 2, kind: input, shape index: {}]   ;;  %s166_s3 = inlined_call_operand.vmem [shape: bf16[2,256], index: 3, kind: output, shape index: {}]  }
   0x1   :  { %v123_v0 = vld [vmem:[%s163_s1 + $0x4] ss:$8 sps:$4 sm:$0xff]   ;;  %76 = vmatprep.mubr.bf16.mxu0 %v126_v1  ;;  %v125_v2 = vld [vmem:[%s163_s1] ss:$8 sps:$4 sm:$0xff]   ;;  %v97_v11 = vunpack.c.l.s4 %v127_v10 }
   0x2   :  { %58 = vmatprep.subr.bf16.mxu0 %v123_v0  ;;  %v15_v3 = vld [vmem:[%s164_s0] sm:$0x1]  ;;  %v21_v5 = vshrl.u32 %v20_v4, 7 }
   0x3   :  { %59 = vmatpush1.bf16.msra.mxu0 %v125_v2  ;;  %v18_v7 = vld [vmem:[%s165_s2] sm:$0x3]  ;;  %v98_v16 = vunpack.c.0.s8 %v97_v11 }
   0x4   :  { %v22_v6 = vsub.s32 0, %v21_v5  ;;  %v26_v8 = vsub.s32 1, %v21_v5 }
   0x5   :  { %v101_v21 = vsub.s32 %v98_v16, %v21_v5 }
   0x6   :  { %118 = vmatmul.mubr.msk.bf16.vlgmr.msra.gmra.mxu0 %vm40_vm0, %v15_v3  ;;  %v23_v9 = vrot.slane %v18_v7, %v22_v6  ;;  %v27_v12 = vrot.slane %v18_v7, %v26_v8 }
  0xc6   :  { %v78_v13 = vpop.f32.mrf.mxu0 }
  0xc7   :  { %v79_v14 = vadd.f32 %v78_v13, %v23_v9 }
  0xc8   :  { %v80_v15 = vpop.f32.mrf.mxu0 }
  0xc9   :  { %v87_v17 = vmul.f32 0.01, %v79_v14  ;;  %v81_v18 = vadd.f32 %v80_v15, %v27_v12  ;;  %vm85_vm1 = vcmp.ge.f32.partialorder %v79_v14, 0.0 }
  0xca   :  { %v82_v19 = vpop.f32.mrf.mxu0 }
  0xcb   :  { %vm86_vm2 = vcmp.ge.f32.partialorder %v81_v18, 0.0  ;;  %v88_v20 = vmul.f32 0.01, %v81_v18  ;;  %v89_v23 = vsel %vm85_vm1, %v79_v14, %v87_v17 }
  0xcc   :  { %v83_v22 = vpop.f32.mrf.mxu0 }
  0xcd   :  { %v90_v24 = vsel %vm86_vm2, %v81_v18, %v88_v20 }
  0xce   :  { %v119_v25 = vpack.c.bf16 %v90_v24, %v89_v23 }
  0xd0   :  { %v102_v26 = vrot.slane %v119_v25, %v101_v21 }
  0xd2   :  { %120 = vst.sshfl [vmem:[%s166_s3] sm:$0x5 pattern:$0x73625140] %v102_v26 }

// kernel: forward.6
= control target key start
LH: loop header
LB: loop body
LE: loop exit
PB: predicated region body
PF: predicated region fallthrough
CT: control target
= control target key end

     0   :  { %10 = vsyncpa [#allocation3], 0  ;;  %s770_s18 = smov [#allocation2]   ;;  %s858_s0 = inlined_call_operand.vmem [shape: bf16[8,576], index: 0, kind: input, shape index: {}]   ;;  %s859_s1 = inlined_call_operand.hbm [shape: bf16[576,128], index: 1, kind: input, shape index: {}]   ;;  %s860_s2 = inlined_call_operand.vmem [shape: f32[1,128], index: 2, kind: input, shape index: {}]   ;;  %s861_s3 = inlined_call_operand.vmem [shape: f32[1,32], index: 3, kind: input, shape index: {}]   ;;  %s862_s4 = inlined_call_operand.vmem [shape: f32[1,32], index: 4, kind: input, shape index: {}]   ;;  %s863_s5 = inlined_call_operand.vmem [shape: bf16[8,128], index: 5, kind: output, shape index: {}]  }
   0x1   :  { %s18_s19 = sshll.u32 %s770_s18, 4  ;;  %s19_s19 = int_to_ptr.vmem [resolvable:$true] %s18_s19 }
   0x2   :  { %s756_s20 = scalar_lea.vmem %s19_s19, 4608  ;;  %p761_p1 = scmp.lt.s32.totalorder %s19_s19, %s19_s19 }
   0x3   :  { %p757_p0 = scmp.ne.s32.totalorder %s19_s19, %s756_s20  ;;  %p762_p2 = scmp.lt.s32.totalorder %s756_s20, %s756_s20 }
   0x5   :  { %p763_p3 = por %p762_p2, %p761_p1 }
   0x7   :  { %p764_p4 = pnand %p763_p3, %p757_p0 }
   0x9   :  { %767 = shalt.err (!%p764_p4)
}
   0xa   :  { %s771_s21 = smov 64   ;;  %s772_s22 = smov 4  }
   0xb   :  { %24 = dma.hbm_to_vmem [thread:$0]  %s859_s1, 4608, %s19_s19, [#allocation3], %s771_s21, %s771_s21, %s772_s22  }
   0xc   :  { %768 = dma.done.wait [#allocation3], 4608  }
   0xd   :  { %769 = vsyncadd [#allocation3], 4294962688  ;;  %v705_v0 = vld [vmem:[#allocation2 + $0x78] sm:$0xff]   ;;  %v709_v4 = vld [vmem:[#allocation2 + $0x70] sm:$0xff]   ;;  %v773_v35 = vmov 0.0   ;;  %vm774_vm0 = vmmov 0  }
   0xe   :  { %v706_v1 = vld [vmem:[#allocation2 + $0x38] sm:$0xff]   ;;  %637 = vmatprep.subr.bf16.mxu0 %v705_v0  ;;  %v710_v5 = vld [vmem:[#allocation2 + $0x30] sm:$0xff]   ;;  %v713_v8 = vld [vmem:[#allocation2 + $0x68] sm:$0xff]   ;;  %vm350_vm1 = vcmask 523264   ;;  %s776_s7 = smov 96   ;;  %vm504_vm2 = vcmask 261120  }
   0xf   :  { %v707_v2 = vld [vmem:[#allocation2 + $0xf8] sm:$0xff]   ;;  %638 = vmatpush3.bf16.msra.mxu0 %v706_v1  ;;  %v711_v6 = vld [vmem:[#allocation2 + $0xf0] sm:$0xff]   ;;  %v714_v9 = vld [vmem:[#allocation2 + $0x28] sm:$0xff]   ;;  %vm507_vm3 = vcmask 785408  }
  0x10   :  { %v708_v3 = vld [vmem:[#allocation2 + $0xb8] sm:$0xff]   ;;  %659 = vmatprep.subr.bf16.mxu1 %v707_v2  ;;  %639 = vmatprep.subr.bf16.mxu0 %v709_v4  ;;  %v712_v7 = vld [vmem:[#allocation2 + $0xb0] sm:$0xff]   ;;  %v715_v10 = vld [vmem:[#allocation2 + $0xe8] sm:$0xff]  }
  0x11   :  { %660 = vmatpush3.bf16.msra.mxu1 %v708_v3  ;;  %v716_v11 = vld [vmem:[#allocation2 + $0xa8] sm:$0xff]   ;;  %v717_v12 = vld [vmem:[#allocation2 + $0x60] sm:$0xff]   ;;  %v721_v16 = vld [vmem:[#allocation2 + $0x58] sm:$0xff]  }
  0x12   :  { %661 = vmatprep.subr.bf16.mxu1 %v711_v6  ;;  %v718_v13 = vld [vmem:[#allocation2 + $0x20] sm:$0xff]   ;;  %v722_v17 = vld [vmem:[#allocation2 + $0x18] sm:$0xff]   ;;  %v725_v20 = vld [vmem:[#allocation2 + $0x50] sm:$0xff]  }
  0x13   :  { %640 = vmatpush3.bf16.msra.mxu0 %v710_v5  ;;  %v719_v14 = vld [vmem:[#allocation2 + $0xe0] sm:$0xff]   ;;  %v723_v18 = vld [vmem:[#allocation2 + $0xd8] sm:$0xff]   ;;  %v726_v21 = vld [vmem:[#allocation2 + $0x10] sm:$0xff]  }
  0x14   :  { %641 = vmatprep.subr.bf16.mxu0 %v713_v8  ;;  %v720_v15 = vld [vmem:[#allocation2 + $0xa0] sm:$0xff]   ;;  %v724_v19 = vld [vmem:[#allocation2 + $0x98] sm:$0xff]   ;;  %v727_v22 = vld [vmem:[#allocation2 + $0xd0] sm:$0xff]  }
  0x15   :  { %662 = vmatpush3.bf16.msra.mxu1 %v712_v7  ;;  %v728_v23 = vld [vmem:[#allocation2 + $0x90] sm:$0xff]   ;;  %v729_v24 = vld [vmem:[#allocation2 + $0x48] sm:$0xff]   ;;  %v733_v28 = vld [vmem:[#allocation2 + $0x40] sm:$0xff]  }
  0x16   :  { %663 = vmatprep.subr.bf16.mxu1 %v715_v10  ;;  %v730_v25 = vld [vmem:[#allocation2 + $0x8] sm:$0xff]   ;;  %v734_v29 = vld [vmem:[#allocation2] sm:$0xff]   ;;  %v741_v39 = vld [vmem:[#allocation2 + $0x118] sm:$0xff]  }
  0x17   :  { %642 = vmatpush3.bf16.msra.mxu0 %v714_v9  ;;  %v731_v26 = vld [vmem:[#allocation2 + $0xc8] sm:$0xff]   ;;  %v735_v30 = vld [vmem:[#allocation2 + $0xc0] sm:$0xff]   ;;  %v742_v40 = vld [vmem:[#allocation2 + $0x110] sm:$0xff]  }
  0x18   :  { %643 = vmatprep.subr.bf16.mxu0 %v717_v12  ;;  %v732_v27 = vld [vmem:[#allocation2 + $0x88] sm:$0xff]   ;;  %v35_v31 = vld [vmem:[%s858_s0] sm:$0xff]  ;;  %v745_v43 = vld [vmem:[%s858_s0 + $0x10] ss:$0 sps:$4 sm:$0xff]  }
  0x19   :  { %664 = vmatpush3.bf16.msra.mxu1 %v716_v11  ;;  %v595_v32 = vcombine.low %v35_v31, %v35_v31  ;;  %v596_v33 = vcombine.high %v35_v31, %v35_v31  ;;  %v738_v34 = vld [vmem:[#allocation2 + $0x80] sm:$0xff]   ;;  %v36_v36 = vld [vmem:[%s858_s0 + $0x8] sm:$0xff]  ;;  %s775_s0 = smov 32   ;;  %v509_v11 = vlaneseq }
  0x1a   :  { %665 = vmatprep.subr.bf16.mxu1 %v719_v14  ;;  %v597_v37 = vcombine.low %v36_v36, %v36_v36  ;;  %v598_v38 = vcombine.high %v36_v36, %v36_v36  ;;  %v743_v41 = vld [vmem:[#allocation2 + $0x108] sm:$0xff]   ;;  %v744_v42 = vld [vmem:[#allocation2 + $0x100] sm:$0xff]  }
  0x1b   :  { %644 = vmatpush3.bf16.msra.mxu0 %v718_v13  ;;  %386 = vmatprep.mubr.bf16.mxu0 %v596_v33  ;;  %v594_v52 = vld [vmem:[%s860_s2] ss:$0 sm:$0xff]  ;;  %v510_v12 = vshrl.u32 %v509_v11, 7 }
  0x1c   :  { %645 = vmatprep.subr.bf16.mxu0 %v721_v16  ;;  %426 = vmatprep.mubr.bf16.mxu1 %v598_v38 }
  0x1d   :  { %666 = vmatpush3.bf16.msra.mxu1 %v720_v15  ;;  %v511_v16 = vsub.s32 0, %v510_v12 }
  0x1e   :  { %667 = vmatprep.subr.bf16.mxu1 %v723_v18 }
  0x1f   :  { %646 = vmatpush3.bf16.msra.mxu0 %v722_v17 }
  0x20   :  { %647 = vmatprep.subr.bf16.mxu0 %v725_v20 }
  0x21   :  { %668 = vmatpush3.bf16.msra.mxu1 %v724_v19 }
  0x22   :  { %669 = vmatprep.subr.bf16.mxu1 %v727_v22 }
  0x23   :  { %648 = vmatpush3.bf16.msra.mxu0 %v726_v21 }
  0x24   :  { %649 = vmatprep.subr.bf16.mxu0 %v729_v24 }
  0x25   :  { %670 = vmatpush3.bf16.msra.mxu1 %v728_v23 }
  0x26   :  { %671 = vmatprep.subr.bf16.mxu1 %v731_v26 }
  0x27   :  { %650 = vmatpush3.bf16.msra.mxu0 %v730_v25 }
  0x28   :  { %651 = vmatprep.subr.bf16.mxu0 %v733_v28 }
  0x29   :  { %672 = vmatpush3.bf16.msra.mxu1 %v732_v27 }
  0x2a   :  { %673 = vmatprep.subr.bf16.mxu1 %v735_v30 }
  0x2b   :  { %652 = vmatpush3.bf16.msra.mxu0 %v734_v29  ;;  %v556_v29 = vld [vmem:[%s862_s4] sm:$0x1] }
  0x2c   :  { %686 = vmatprep.subr.bf16.mxu0 %v773_v35  ;;  %v561_v30 = vrot.slane %v556_v29, %v511_v16 }
  0x2d   :  { %674 = vmatpush3.bf16.msra.mxu1 %v738_v34 }
  0x2e   :  { %387 = vmatmul.mubr.bf16.vlgmr.msra.gmra.mxu0 %v595_v32 }
  0x2f   :  { %687 = vmatpush3.bf16.msra.mxu0 %v741_v39  ;;  %694 = vmatprep.mubr.msk.bf16.mxu0 %vm774_vm0, %v773_v35  ;;  %v535_v39 = vld [vmem:[%s861_s3] sm:$0x1] }
  0x30   :  { %427 = vmatmul.mubr.bf16.vlgmr.msra.gmra.mxu1 %v597_v37  ;;  %688 = vmatprep.subr.bf16.mxu0 %v773_v35 }
  0x33   :  { %689 = vmatpush3.bf16.msra.mxu0 %v742_v40 }
  0x34   :  { %690 = vmatprep.subr.bf16.mxu0 %v773_v35 }
  0x37   :  { %691 = vmatpush3.bf16.msra.mxu0 %v743_v41 }
  0x38   :  { %692 = vmatprep.subr.bf16.mxu0 %v773_v35 }
  0x3b   :  { %693 = vmatpush3.bf16.msra.mxu0 %v744_v42 }
  0x3e   :  { %695 = vmatmul.mubr.msk.bf16.vlgmr.msra.gmra.mxu0 %vm350_vm1, %v745_v43 }
  0xee   :  { %v653_v44 = vpop.f32.mrf.mxu0 }
  0xf0   :  { %v654_v45 = vpop.f32.mrf.mxu0  ;;  %v675_v46 = vpop.f32.mrf.mxu1 }
  0xf1   :  { %v655_v51 = vadd.f32 %v654_v45, %v653_v44 }
  0xf2   :  { %v656_v47 = vpop.f32.mrf.mxu0  ;;  %v676_v48 = vpop.f32.mrf.mxu1 }
  0xf3   :  { %v389_v54 = vadd.f32 %v655_v51, %v594_v52  ;;  %v677_v55 = vadd.f32 %v676_v48, %v675_v46 }
  0xf4   :  { %v657_v49 = vpop.f32.mrf.mxu0  ;;  %v678_v50 = vpop.f32.mrf.mxu1 }
  0xf5   :  { %v429_v56 = vadd.f32 %v677_v55, %v389_v54 }
  0xf6   :  { %v679_v53 = vpop.f32.mrf.mxu1 }
  0xfe   :  { %v468_v57 = vpop.f32.mrf.mxu0 }
  0xff   :  { %v469_v58 = vadd.f32 %v468_v57, %v429_v56 }
 0x100   :  { %v696_v59 = vpop.f32.mrf.mxu0 }
 0x101   :  { %v474_v60 = vrot.slane %v469_v58, 4 }
 0x102   :  { %v471_v61 = vpop.f32.mrf.mxu0 }
 0x103   :  { %v475_v62 = vadd.f32 %v474_v60, %v469_v58 }
 0x104   :  { %v697_v63 = vpop.f32.mrf.mxu0 }
 0x105   :  { %v476_v0 = vrot.slane %v475_v62, 2 }
 0x107   :  { %v477_v1 = vadd.f32 %v476_v0, %v475_v62 }
 0x109   :  { %v478_v2 = vrot.slane %v477_v1, 1 }
 0x10b   :  { %v479_v3 = vadd.f32 %v478_v2, %v477_v1 }
 0x10d   :  { %489 = vrot.lane.b32.xlu1 %v479_v3, %s775_s0  ;;  %481 = vrot.lane.b32.xlu0 %v479_v3, %s776_s7 }
 0x111   :  { %485 = vrot.lane.b32.xlu0 %v479_v3, %s771_s21 }
 0x17f   :  { %v482_v4 = vpop.permute.xlu0 %481  ;;  %v490_v8 = vpop.permute.xlu1 %489 }
 0x180   :  { %v484_v5 = vadd.f32 %v482_v4, %v479_v3 }
 0x183   :  { %v486_v6 = vpop.permute.xlu0 %485 }
 0x184   :  { %v488_v7 = vadd.f32 %v486_v6, %v484_v5 }
 0x186   :  { %v492_v9 = vadd.f32 %v490_v8, %v488_v7 }
 0x188   :  { %v493_v10 = vmul.f32 0.03125, %v492_v9 }
 0x18a   :  { %498 = vrot.lane.b32.xlu0 %v493_v10, %s771_s21  ;;  %495 = vrot.lane.b32.xlu1 %v493_v10, %s775_s0 }
 0x18e   :  { %501 = vrot.lane.b32.xlu1 %v493_v10, %s776_s7 }
 0x1fc   :  { %v496_v13 = vpop.permute.xlu1 %495  ;;  %v499_v14 = vpop.permute.xlu0 %498 }
 0x1fd   :  { %v505_v15 = vsel %vm504_vm2, %v493_v10, %v496_v13 }
 0x1fe   :  { %v506_v17 = vsel %vm350_vm1, %v505_v15, %v499_v14 }
 0x200   :  { %v502_v18 = vpop.permute.xlu1 %501 }
 0x201   :  { %v508_v19 = vsel %vm507_vm3, %v506_v17, %v502_v18 }
 0x202   :  { %v512_v20 = vrot.slane %v508_v19, %v511_v16 }
 0x204   :  { %v513_v21 = vsub.f32 %v469_v58, %v512_v20 }
 0x206   :  { %v514_v22 = vmul.f32 %v513_v21, %v513_v21 }
 0x208   :  { %v515_v23 = vrot.slane %v514_v22, 4 }
 0x20a   :  { %v516_v24 = vadd.f32 %v515_v23, %v514_v22 }
 0x20c   :  { %v517_v25 = vrot.slane %v516_v24, 2 }
 0x20e   :  { %v518_v26 = vadd.f32 %v517_v25, %v516_v24 }
 0x210   :  { %v519_v27 = vrot.slane %v518_v26, 1 }
 0x212   :  { %v520_v28 = vadd.f32 %v519_v27, %v518_v26 }
 0x214   :  { %526 = vrot.lane.b32.xlu1 %v520_v28, %s771_s21  ;;  %522 = vrot.lane.b32.xlu0 %v520_v28, %s776_s7 }
 0x218   :  { %530 = vrot.lane.b32.xlu0 %v520_v28, %s775_s0 }
 0x21c   :  { %562 = vrot.lane.b32.xlu0 %v561_v30, %s775_s0 }
 0x286   :  { %v523_v31 = vpop.permute.xlu0 %522  ;;  %v527_v33 = vpop.permute.xlu1 %526 }
 0x287   :  { %v525_v32 = vadd.f32 %v523_v31, %v520_v28 }
 0x289   :  { %v529_v34 = vadd.f32 %v527_v33, %v525_v32 }
 0x28a   :  { %v531_v35 = vpop.permute.xlu0 %530 }
 0x28b   :  { %v533_v36 = vadd.f32 %v531_v35, %v529_v34 }
 0x28d   :  { %v534_v37 = vmul.f32 0.03125, %v533_v36 }
 0x28e   :  { %v563_v43 = vpop.permute.xlu0 %562 }
 0x28f   :  { %v536_v38 = vadd.f32 1e-05, %v534_v37  ;;  %v571_v52 = vsel %vm504_vm2, %v556_v29, %v563_v43 }
 0x291   :  { %746 = vrsqrt.f32 %v536_v38 }
 0x29e   :  { %v747_v40 = vpop.eup %746 }
 0x29f   :  { %v538_v41 = vmul.f32 %v747_v40, %v535_v39 }
 0x2a1   :  { %v543_v42 = vrot.slane %v538_v41, %v511_v16 }
 0x2a3   :  { %547 = vrot.lane.b32.xlu0 %v543_v42, %s771_s21  ;;  %544 = vrot.lane.b32.xlu1 %v543_v42, %s775_s0 }
 0x2a7   :  { %550 = vrot.lane.b32.xlu1 %v543_v42, %s776_s7  ;;  %568 = vrot.lane.b32.xlu0 %v561_v30, %s776_s7 }
 0x2ab   :  { %565 = vrot.lane.b32.xlu1 %v561_v30, %s771_s21 }
 0x315   :  { %v545_v44 = vpop.permute.xlu1 %544  ;;  %v548_v46 = vpop.permute.xlu0 %547 }
 0x316   :  { %v553_v45 = vsel %vm504_vm2, %v538_v41, %v545_v44 }
 0x317   :  { %v554_v47 = vsel %vm350_vm1, %v553_v45, %v548_v46 }
 0x319   :  { %v551_v48 = vpop.permute.xlu1 %550  ;;  %v569_v51 = vpop.permute.xlu0 %568 }
 0x31a   :  { %v555_v49 = vsel %vm507_vm3, %v554_v47, %v551_v48 }
 0x31b   :  { %v577_v50 = vrot.slane %v555_v49, %v511_v16 }
 0x31d   :  { %v566_v53 = vpop.permute.xlu1 %565  ;;  %v578_v56 = vmul.f32 %v577_v50, %v513_v21 }
 0x31e   :  { %v572_v54 = vsel %vm350_vm1, %v571_v52, %v566_v53 }
 0x31f   :  { %v573_v55 = vsel %vm507_vm3, %v572_v54, %v569_v51 }
 0x320   :  { %v582_v57 = vrot.slane %v573_v55, %v511_v16 }
 0x322   :  { %v583_v58 = vadd.f32 %v582_v57, %v578_v56 }
 0x324   :  { %vm584_vm4 = vcmp.ge.f32.partialorder %v583_v58, 0.0  ;;  %v585_v59 = vmul.f32 0.01, %v583_v58 }
 0x326   :  { %v586_v60 = vsel %vm584_vm4, %v583_v58, %v585_v59 }
 0x327   :  { %v587_v61 = vpack.c.bf16 %v586_v60, %v586_v60 }
 0x329   :  { %588 = vst [vmem:[%s863_s5] sm:$0xf] %v587_v61 }
 0x32a   :  { %593 = vsyncpa [#allocation3], 1 }

// kernel: forward.7
= control target key start
LH: loop header
LB: loop body
LE: loop exit
PB: predicated region body
PF: predicated region fallthrough
CT: control target
= control target key end

     0   :  { %vm210_vm0 = vcmask 261120   ;;  %s598_s17 = smov 64   ;;  %vm349_vm1 = vcmask 523264   ;;  %vm351_vm2 = vcmask 785408   ;;  %s749_s1 = inlined_call_operand.vmem [shape: bf16[288,128], index: 1, kind: input, shape index: {}]   ;;  %s750_s0 = inlined_call_operand.vmem [shape: bf16[32,288], index: 0, kind: input, shape index: {}]   ;;  %s751_s2 = inlined_call_operand.vmem [shape: f32[1,128], index: 2, kind: input, shape index: {}]   ;;  %s752_s4 = inlined_call_operand.vmem [shape: f32[1,32], index: 4, kind: input, shape index: {}]   ;;  %s753_s3 = inlined_call_operand.vmem [shape: f32[1,32], index: 3, kind: input, shape index: {}]   ;;  %s754_s5 = inlined_call_operand.vmem [shape: bf16[32,128], index: 5, kind: output, shape index: {}]  }
   0x1   :  { %v568_v0 = vld [vmem:[%s749_s1 + $0x78] sm:$0xff]   ;;  %v570_v2 = vld [vmem:[%s749_s1 + $0x70] sm:$0xff]   ;;  %v572_v4 = vld [vmem:[%s749_s1 + $0x68] sm:$0xff]  }
   0x2   :  { %v569_v1 = vld [vmem:[%s749_s1 + $0x38] sm:$0xff]   ;;  %525 = vmatprep.subr.bf16.mxu0 %v568_v0  ;;  %v571_v3 = vld [vmem:[%s749_s1 + $0x30] sm:$0xff]   ;;  %v573_v5 = vld [vmem:[%s749_s1 + $0x28] sm:$0xff]  }
   0x3   :  { %526 = vmatpush3.bf16.msra.mxu0 %v569_v1  ;;  %v574_v6 = vld [vmem:[%s749_s1 + $0x60] sm:$0xff]   ;;  %v576_v8 = vld [vmem:[%s749_s1 + $0x58] sm:$0xff]   ;;  %v582_v9 = vld [vmem:[%s749_s1 + $0x88] sm:$0xff]   ;;  %v353_v1 = vlaneseq }
   0x4   :  { %527 = vmatprep.subr.bf16.mxu0 %v570_v2  ;;  %v575_v7 = vld [vmem:[%s749_s1 + $0x20] sm:$0xff]   ;;  %v577_v10 = vld [vmem:[%s749_s1 + $0x18] sm:$0xff]   ;;  %v578_v11 = vld [vmem:[%s749_s1 + $0x50] sm:$0xff]   ;;  %557 = vmatprep.subr.bf16.mxu1 %v582_v9 }
   0x5   :  { %v579_v12 = vld [vmem:[%s749_s1 + $0x10] sm:$0xff]   ;;  %558 = vmatpush3.bf16.msra.mxu1 %v582_v9  ;;  %v585_v13 = vld [vmem:[%s749_s1 + $0x80] sm:$0xff]   ;;  %v580_v14 = vld [vmem:[%s749_s1 + $0x48] sm:$0xff]   ;;  %v354_v2 = vshrl.u32 %v353_v1, 7 }
   0x6   :  { %559 = vmatprep.subr.bf16.mxu1 %v585_v13  ;;  %v588_v15 = vld [vmem:[%s750_s0 + $0x4] ss:$12 sps:$4 sm:$0xff]   ;;  %v589_v16 = vld [vmem:[%s750_s0 + $0x8] ss:$12 sps:$4 sm:$0xff]   ;;  %v590_v17 = vld [vmem:[%s750_s0 + $0x20] ss:$12 sps:$4 sm:$0xff]  }
   0x7   :  { %528 = vmatpush3.bf16.msra.mxu0 %v571_v3  ;;  %249 = vmatprep.mubr.bf16.mxu0 %v588_v15  ;;  %v581_v18 = vld [vmem:[%s749_s1 + $0x8] sm:$0xff]   ;;  %v583_v19 = vld [vmem:[%s749_s1 + $0x40] sm:$0xff]  }
   0x8   :  { %529 = vmatprep.subr.bf16.mxu0 %v572_v4  ;;  %561 = vmatprep.mubr.msk.bf16.mxu1 %vm210_vm0, %v589_v16  ;;  %v584_v20 = vld [vmem:[%s749_s1] sm:$0xff]   ;;  %v591_v22 = vld [vmem:[%s750_s0 + $0x1c] ss:$12 sps:$4 sm:$0xff]  }
   0x9   :  { %560 = vmatpush3.bf16.msra.mxu1 %v585_v13  ;;  %v586_v21 = vld [vmem:[%s750_s0] ss:$12 sps:$4 sm:$0xff]   ;;  %v593_v23 = vld [vmem:[%s750_s0 + $0x18] ss:$12 sps:$4 sm:$0xff]   ;;  %s596_s0 = smov 32  }
   0xa   :  { %v479_v32 = vld [vmem:[%s751_s2] ss:$0 sm:$0xff]  ;;  %s597_s2 = smov 96  }
   0xb   :  { %530 = vmatpush3.bf16.msra.mxu0 %v573_v5 }
   0xc   :  { %531 = vmatprep.subr.bf16.mxu0 %v574_v6  ;;  %562 = vmatmul.mubr.msk.bf16.vlgmr.msra.gmra.mxu1 %vm210_vm0, %v590_v17  ;;  %v713_v6 = vsub.s32 0, %v354_v2 }
   0xf   :  { %532 = vmatpush3.bf16.msra.mxu0 %v575_v7 }
  0x10   :  { %533 = vmatprep.subr.bf16.mxu0 %v576_v8 }
  0x13   :  { %534 = vmatpush3.bf16.msra.mxu0 %v577_v10 }
  0x14   :  { %535 = vmatprep.subr.bf16.mxu0 %v578_v11 }
  0x17   :  { %536 = vmatpush3.bf16.msra.mxu0 %v579_v12 }
  0x18   :  { %537 = vmatprep.subr.bf16.mxu0 %v580_v14 }
  0x1b   :  { %538 = vmatpush3.bf16.msra.mxu0 %v581_v18 }
  0x1c   :  { %539 = vmatprep.subr.bf16.mxu0 %v583_v19 }
  0x1f   :  { %540 = vmatpush3.bf16.msra.mxu0 %v584_v20 }
  0x22   :  { %250 = vmatmul.mubr.bf16.vlgmr.msra.gmra.mxu0 %v586_v21 }
  0x23   :  { %257 = vmatprep.mubr.bf16.mxu0 %v591_v22 }
  0x2a   :  { %258 = vmatmul.mubr.bf16.gmra.mxu0 %v593_v23 }
  0xcc   :  { %v563_v25 = vpop.f32.mrf.mxu1 }
  0xce   :  { %v300_v28 = vpop.f32.mrf.mxu1 }
  0xd0   :  { %v564_v33 = vpop.f32.mrf.mxu1 }
  0xd2   :  { %v303_v39 = vpop.f32.mrf.mxu1 }
  0xe2   :  { %v541_v24 = vpop.f32.mrf.mxu0 }
  0xe4   :  { %v542_v26 = vpop.f32.mrf.mxu0 }
  0xe5   :  { %v543_v30 = vadd.f32 %v542_v26, %v541_v24 }
  0xe6   :  { %v544_v27 = vpop.f32.mrf.mxu0 }
  0xe7   :  { %v252_v37 = vadd.f32 %v543_v30, %v479_v32 }
  0xe8   :  { %v545_v29 = vpop.f32.mrf.mxu0 }
  0xe9   :  { %v546_v31 = vadd.f32 %v545_v29, %v544_v27  ;;  %v301_v44 = vadd.f32 %v300_v28, %v252_v37  ;;  %v409_v28 = vld [vmem:[%s752_s4] sm:$0x1] }
  0xea   :  { %v547_v34 = vpop.f32.mrf.mxu0  ;;  %v414_v29 = vrot.slane %v409_v28, %v713_v6 }
  0xeb   :  { %v255_v35 = vadd.f32 %v546_v31, %v479_v32 }
  0xec   :  { %v548_v36 = vpop.f32.mrf.mxu0 }
  0xed   :  { %v549_v38 = vadd.f32 %v548_v36, %v547_v34  ;;  %v304_v41 = vadd.f32 %v303_v39, %v255_v35 }
  0xee   :  { %v550_v40 = vpop.f32.mrf.mxu0 }
  0xef   :  { %v260_v42 = vadd.f32 %v549_v38, %v479_v32  ;;  %v315_v47 = vadd.f32 %v304_v41, %v301_v44  ;;  %v388_v38 = vld [vmem:[%s753_s3] sm:$0x1] }
  0xf0   :  { %v551_v43 = vpop.f32.mrf.mxu0 }
  0xf1   :  { %v309_v45 = vadd.f32 %v563_v25, %v260_v42  ;;  %v552_v46 = vadd.f32 %v551_v43, %v550_v40 }
  0xf3   :  { %v263_v48 = vadd.f32 %v552_v46, %v479_v32  ;;  %v316_v49 = vadd.f32 %v315_v47, %v309_v45 }
  0xf5   :  { %v312_v50 = vadd.f32 %v564_v33, %v263_v48 }
  0xf7   :  { %v317_v51 = vadd.f32 %v316_v49, %v312_v50 }
  0xf9   :  { %v318_v52 = vrot.slane %v317_v51, 4 }
  0xfb   :  { %v319_v53 = vadd.f32 %v318_v52, %v317_v51 }
  0xfd   :  { %v320_v54 = vrot.slane %v319_v53, 2 }
  0xff   :  { %v321_v55 = vadd.f32 %v320_v54, %v319_v53 }
 0x101   :  { %v322_v56 = vrot.slane %v321_v55, 1 }
 0x103   :  { %v323_v57 = vadd.f32 %v322_v56, %v321_v55 }
 0x105   :  { %333 = vrot.lane.b32.xlu1 %v323_v57, %s596_s0  ;;  %325 = vrot.lane.b32.xlu0 %v323_v57, %s597_s2 }
 0x109   :  { %329 = vrot.lane.b32.xlu0 %v323_v57, %s598_s17 }
 0x177   :  { %v326_v58 = vpop.permute.xlu0 %325  ;;  %v334_v62 = vpop.permute.xlu1 %333 }
 0x178   :  { %v328_v59 = vadd.f32 %v326_v58, %v323_v57 }
 0x17b   :  { %v330_v60 = vpop.permute.xlu0 %329 }
 0x17c   :  { %v332_v61 = vadd.f32 %v330_v60, %v328_v59 }
 0x17e   :  { %v336_v63 = vadd.f32 %v334_v62, %v332_v61 }
 0x180   :  { %v337_v0 = vmul.f32 0.0078125, %v336_v63 }
 0x182   :  { %342 = vrot.lane.b32.xlu0 %v337_v0, %s598_s17  ;;  %339 = vrot.lane.b32.xlu1 %v337_v0, %s596_s0 }
 0x186   :  { %345 = vrot.lane.b32.xlu1 %v337_v0, %s597_s2 }
 0x1f4   :  { %v340_v3 = vpop.permute.xlu1 %339  ;;  %v343_v4 = vpop.permute.xlu0 %342 }
 0x1f5   :  { %v348_v5 = vsel %vm210_vm0, %v337_v0, %v340_v3 }
 0x1f6   :  { %v350_v7 = vsel %vm349_vm1, %v348_v5, %v343_v4 }
 0x1f8   :  { %v346_v8 = vpop.permute.xlu1 %345 }
 0x1f9   :  { %v352_v9 = vsel %vm351_vm2, %v350_v7, %v346_v8 }
 0x1fa   :  { %v356_v10 = vrot.slane %v352_v9, %v713_v6 }
 0x1fc   :  { %v357_v11 = vsub.f32 %v301_v44, %v356_v10  ;;  %v358_v12 = vsub.f32 %v304_v41, %v356_v10  ;;  %v359_v13 = vsub.f32 %v309_v45, %v356_v10  ;;  %v360_v14 = vsub.f32 %v312_v50, %v356_v10 }
 0x1fe   :  { %v361_v15 = vmul.f32 %v357_v11, %v357_v11  ;;  %v362_v16 = vmul.f32 %v358_v12, %v358_v12  ;;  %v363_v17 = vmul.f32 %v359_v13, %v359_v13  ;;  %v364_v19 = vmul.f32 %v360_v14, %v360_v14 }
 0x200   :  { %v365_v18 = vadd.f32 %v362_v16, %v361_v15 }
 0x202   :  { %v366_v20 = vadd.f32 %v365_v18, %v363_v17 }
 0x204   :  { %v367_v21 = vadd.f32 %v366_v20, %v364_v19 }
 0x206   :  { %v368_v22 = vrot.slane %v367_v21, 4 }
 0x208   :  { %v369_v23 = vadd.f32 %v368_v22, %v367_v21 }
 0x20a   :  { %v370_v24 = vrot.slane %v369_v23, 2 }
 0x20c   :  { %v371_v25 = vadd.f32 %v370_v24, %v369_v23 }
 0x20e   :  { %v372_v26 = vrot.slane %v371_v25, 1 }
 0x210   :  { %v373_v27 = vadd.f32 %v372_v26, %v371_v25 }
 0x212   :  { %379 = vrot.lane.b32.xlu1 %v373_v27, %s598_s17  ;;  %375 = vrot.lane.b32.xlu0 %v373_v27, %s597_s2 }
 0x216   :  { %383 = vrot.lane.b32.xlu0 %v373_v27, %s596_s0 }
 0x21a   :  { %415 = vrot.lane.b32.xlu0 %v414_v29, %s596_s0 }
 0x284   :  { %v376_v30 = vpop.permute.xlu0 %375  ;;  %v380_v32 = vpop.permute.xlu1 %379 }
 0x285   :  { %v378_v31 = vadd.f32 %v376_v30, %v373_v27 }
 0x287   :  { %v382_v33 = vadd.f32 %v380_v32, %v378_v31 }
 0x288   :  { %v384_v34 = vpop.permute.xlu0 %383 }
 0x289   :  { %v386_v35 = vadd.f32 %v384_v34, %v382_v33 }
 0x28b   :  { %v387_v36 = vmul.f32 0.0078125, %v386_v35 }
 0x28c   :  { %v416_v42 = vpop.permute.xlu0 %415 }
 0x28d   :  { %v389_v37 = vadd.f32 1e-05, %v387_v36  ;;  %v424_v51 = vsel %vm210_vm0, %v409_v28, %v416_v42 }
 0x28f   :  { %594 = vrsqrt.f32 %v389_v37 }
 0x29c   :  { %v595_v39 = vpop.eup %594 }
 0x29d   :  { %v391_v40 = vmul.f32 %v595_v39, %v388_v38 }
 0x29f   :  { %v396_v41 = vrot.slane %v391_v40, %v713_v6 }
 0x2a1   :  { %400 = vrot.lane.b32.xlu0 %v396_v41, %s598_s17  ;;  %397 = vrot.lane.b32.xlu1 %v396_v41, %s596_s0 }
 0x2a5   :  { %403 = vrot.lane.b32.xlu1 %v396_v41, %s597_s2  ;;  %421 = vrot.lane.b32.xlu0 %v414_v29, %s597_s2 }
 0x2a9   :  { %418 = vrot.lane.b32.xlu1 %v414_v29, %s598_s17 }
 0x313   :  { %v398_v43 = vpop.permute.xlu1 %397  ;;  %v401_v45 = vpop.permute.xlu0 %400 }
 0x314   :  { %v406_v44 = vsel %vm210_vm0, %v391_v40, %v398_v43 }
 0x315   :  { %v407_v46 = vsel %vm349_vm1, %v406_v44, %v401_v45 }
 0x317   :  { %v404_v47 = vpop.permute.xlu1 %403  ;;  %v422_v50 = vpop.permute.xlu0 %421 }
 0x318   :  { %v408_v48 = vsel %vm351_vm2, %v407_v46, %v404_v47 }
 0x319   :  { %v430_v49 = vrot.slane %v408_v48, %v713_v6 }
 0x31b   :  { %v419_v52 = vpop.permute.xlu1 %418  ;;  %v431_v54 = vmul.f32 %v430_v49, %v357_v11  ;;  %v432_v56 = vmul.f32 %v430_v49, %v358_v12  ;;  %v433_v57 = vmul.f32 %v430_v49, %v359_v13  ;;  %v434_v58 = vmul.f32 %v430_v49, %v360_v14 }
 0x31c   :  { %v425_v53 = vsel %vm349_vm1, %v424_v51, %v419_v52 }
 0x31d   :  { %v426_v55 = vsel %vm351_vm2, %v425_v53, %v422_v50 }
 0x31e   :  { %v438_v59 = vrot.slane %v426_v55, %v713_v6 }
 0x320   :  { %v439_v60 = vadd.f32 %v438_v59, %v431_v54  ;;  %v440_v61 = vadd.f32 %v438_v59, %v432_v56  ;;  %v441_v62 = vadd.f32 %v438_v59, %v433_v57  ;;  %v442_v63 = vadd.f32 %v438_v59, %v434_v58 }
 0x322   :  { %vm443_vm3 = vcmp.ge.f32.partialorder %v439_v60, 0.0  ;;  %vm444_vm4 = vcmp.ge.f32.partialorder %v440_v61, 0.0  ;;  %vm445_vm5 = vcmp.ge.f32.partialorder %v441_v62, 0.0  ;;  %vm446_vm6 = vcmp.ge.f32.partialorder %v442_v63, 0.0 }
 0x323   :  { %v447_v0 = vmul.f32 0.01, %v439_v60  ;;  %v448_v1 = vmul.f32 0.01, %v440_v61  ;;  %v449_v2 = vmul.f32 0.01, %v441_v62 }
 0x324   :  { %v450_v3 = vmul.f32 0.01, %v442_v63 }
 0x325   :  { %v451_v4 = vsel %vm443_vm3, %v439_v60, %v447_v0  ;;  %v452_v5 = vsel %vm444_vm4, %v440_v61, %v448_v1  ;;  %v453_v7 = vsel %vm445_vm5, %v441_v62, %v449_v2 }
 0x326   :  { %v454_v8 = vsel %vm446_vm6, %v442_v63, %v450_v3  ;;  %v517_v9 = vpack.c.bf16 %v452_v5, %v451_v4 }
 0x327   :  { %v522_v10 = vpack.c.bf16 %v454_v8, %v453_v7 }
 0x328   :  { %518 = vst [vmem:[%s754_s5] sm:$0xff] %v517_v9  }
 0x329   :  { %524 = vst [vmem:[%s754_s5 + $0x8] sm:$0xff] %v522_v10  }

// kernel: forward.8
= control target key start
LH: loop header
LB: loop body
LE: loop exit
PB: predicated region body
PF: predicated region fallthrough
CT: control target
= control target key end

     0   :  { %v813_v0 = vmov 0   ;;  %vm188_vm0 = vcmask 130048   ;;  %s816_s19 = smov 64   ;;  %vm355_vm1 = vcmask 261120   ;;  %vm357_vm2 = vcmask 523264   ;;  %s1154_s1 = inlined_call_operand.vmem [shape: bf16[144,128], index: 1, kind: input, shape index: {}]   ;;  %s1155_s0 = inlined_call_operand.vmem [shape: bf16[128,144], index: 0, kind: input, shape index: {}]   ;;  %s1156_s2 = inlined_call_operand.vmem [shape: f32[1,128], index: 2, kind: input, shape index: {}]   ;;  %s1157_s4 = inlined_call_operand.vmem [shape: f32[1,32], index: 4, kind: input, shape index: {}]   ;;  %s1158_s3 = inlined_call_operand.vmem [shape: f32[1,32], index: 3, kind: input, shape index: {}]   ;;  %s1159_s5 = inlined_call_operand.vmem [shape: bf16[128,128], index: 5, kind: output, shape index: {}]  }
   0x1   :  { %213 = vmatprep.subr.bf16.mxu0 %v813_v0  ;;  %v778_v1 = vld [vmem:[%s1154_s1 + $0x38] sm:$0xff]   ;;  %756 = vmatprep.subr.bf16.mxu1 %v813_v0  ;;  %v779_v2 = vld [vmem:[%s1154_s1 + $0x30] sm:$0xff]   ;;  %v780_v3 = vld [vmem:[%s1154_s1 + $0x28] sm:$0xff]   ;;  %vm359_vm3 = vcmask 785408  }
   0x2   :  { %214 = vmatpush1.bf16.msra.mxu0 %v778_v1  ;;  %765 = vmatpush1.bf16.msra.mxu1 %v778_v1  ;;  %v781_v4 = vld [vmem:[%s1154_s1 + $0x20] sm:$0xff]   ;;  %v782_v7 = vld [vmem:[%s1154_s1 + $0x18] sm:$0xff]   ;;  %v783_v8 = vld [vmem:[%s1154_s1 + $0x10] sm:$0xff]  }
   0x3   :  { %215 = vmatprep.subr.bf16.mxu0 %v813_v0  ;;  %757 = vmatprep.subr.bf16.mxu1 %v813_v0  ;;  %v789_v5 = vld [vmem:[%s1155_s0 + $0x4] ss:$8 sps:$4 sm:$0xff]   ;;  %v787_v12 = vld [vmem:[%s1155_s0] ss:$8 sps:$4 sm:$0xff]   ;;  %v790_v14 = vld [vmem:[%s1155_s0 + $0x14] ss:$8 sps:$4 sm:$0xff]  }
   0x4   :  { %669 = vmatprep.mubr.msk.bf16.mxu0 %vm188_vm0, %v789_v5  ;;  %v795_v6 = vld [vmem:[%s1155_s0 + $0x44] ss:$8 sps:$4 sm:$0xff]   ;;  %v793_v13 = vld [vmem:[%s1155_s0 + $0x40] ss:$8 sps:$4 sm:$0xff]   ;;  %v799_v15 = vld [vmem:[%s1155_s0 + $0x54] ss:$8 sps:$4 sm:$0xff]  }
   0x5   :  { %673 = vmatprep.mubr.msk.bf16.mxu1 %vm188_vm0, %v795_v6  ;;  %v784_v9 = vld [vmem:[%s1154_s1 + $0x8] sm:$0xff]   ;;  %v785_v10 = vld [vmem:[%s1154_s1] sm:$0xff]   ;;  %v792_v16 = vld [vmem:[%s1155_s0 + $0x10] ss:$8 sps:$4 sm:$0xff]  }
   0x6   :  { %216 = vmatpush1.bf16.msra.mxu0 %v779_v2  ;;  %766 = vmatpush1.bf16.msra.mxu1 %v779_v2  ;;  %v786_v11 = vld [vmem:[%s1154_s1 + $0x40] sm:$0xff]   ;;  %v801_v17 = vld [vmem:[%s1155_s0 + $0x50] ss:$8 sps:$4 sm:$0xff]   ;;  %v802_v22 = vld [vmem:[%s1155_s0 + $0x34] ss:$8 sps:$4 sm:$0xff]  }
   0x7   :  { %217 = vmatprep.subr.bf16.mxu0 %v813_v0  ;;  %758 = vmatprep.subr.bf16.mxu1 %v813_v0  ;;  %v796_v18 = vld [vmem:[%s1155_s0 + $0x24] ss:$8 sps:$4 sm:$0xff]   ;;  %v798_v20 = vld [vmem:[%s1155_s0 + $0x20] ss:$8 sps:$4 sm:$0xff]   ;;  %v808_v23 = vld [vmem:[%s1155_s0 + $0x74] ss:$8 sps:$4 sm:$0xff]  }
   0x8   :  { %v805_v19 = vld [vmem:[%s1155_s0 + $0x64] ss:$8 sps:$4 sm:$0xff]   ;;  %v807_v21 = vld [vmem:[%s1155_s0 + $0x60] ss:$8 sps:$4 sm:$0xff]   ;;  %v804_v24 = vld [vmem:[%s1155_s0 + $0x30] ss:$8 sps:$4 sm:$0xff]  }
   0x9   :  { %v810_v25 = vld [vmem:[%s1155_s0 + $0x70] ss:$8 sps:$4 sm:$0xff]   ;;  %v643_v40 = vld [vmem:[%s1156_s2] ss:$0 sm:$0xff]  ;;  %s814_s0 = smov 32   ;;  %s815_s2 = smov 96  }
   0xa   :  { %218 = vmatpush1.bf16.msra.mxu0 %v780_v3  ;;  %767 = vmatpush1.bf16.msra.mxu1 %v780_v3 }
   0xb   :  { %219 = vmatprep.subr.bf16.mxu0 %v813_v0  ;;  %759 = vmatprep.subr.bf16.mxu1 %v813_v0 }
   0xe   :  { %220 = vmatpush1.bf16.msra.mxu0 %v781_v4  ;;  %768 = vmatpush1.bf16.msra.mxu1 %v781_v4 }
   0xf   :  { %221 = vmatprep.subr.bf16.mxu0 %v813_v0  ;;  %760 = vmatprep.subr.bf16.mxu1 %v813_v0 }
  0x12   :  { %222 = vmatpush1.bf16.msra.mxu0 %v782_v7  ;;  %769 = vmatpush1.bf16.msra.mxu1 %v782_v7 }
  0x13   :  { %223 = vmatprep.subr.bf16.mxu0 %v813_v0  ;;  %761 = vmatprep.subr.bf16.mxu1 %v813_v0 }
  0x16   :  { %224 = vmatpush1.bf16.msra.mxu0 %v783_v8  ;;  %770 = vmatpush1.bf16.msra.mxu1 %v783_v8 }
  0x17   :  { %225 = vmatprep.subr.bf16.mxu0 %v813_v0  ;;  %762 = vmatprep.subr.bf16.mxu1 %v813_v0 }
  0x1a   :  { %226 = vmatpush1.bf16.msra.mxu0 %v784_v9  ;;  %771 = vmatpush1.bf16.msra.mxu1 %v784_v9 }
  0x1b   :  { %227 = vmatprep.subr.bf16.mxu0 %v813_v0  ;;  %763 = vmatprep.subr.bf16.mxu1 %v813_v0 }
  0x1e   :  { %228 = vmatpush1.bf16.msra.mxu0 %v785_v10  ;;  %772 = vmatpush1.bf16.msra.mxu1 %v785_v10 }
  0x1f   :  { %243 = vmatprep.subr.bf16.mxu0 %v813_v0  ;;  %764 = vmatprep.subr.bf16.mxu1 %v813_v0 }
  0x22   :  { %244 = vmatpush2.bf16.msra.mxu0 %v786_v11  ;;  %773 = vmatpush2.bf16.msra.mxu1 %v786_v11 }
  0x25   :  { %246 = vmatmul.mubr.bf16.vlgmr.msra.gmra.mxu0 %v787_v12  ;;  %278 = vmatmul.mubr.bf16.vlgmr.msra.gmra.mxu1 %v793_v13 }
  0x26   :  { %670 = vmatprep.mubr.msk.bf16.mxu0 %vm188_vm0, %v790_v14  ;;  %674 = vmatprep.mubr.msk.bf16.mxu1 %vm188_vm0, %v799_v15 }
  0x2d   :  { %254 = vmatmul.mubr.bf16.gmra.mxu0 %v792_v16  ;;  %286 = vmatmul.mubr.bf16.gmra.mxu1 %v801_v17 }
  0x2e   :  { %671 = vmatprep.mubr.msk.bf16.mxu0 %vm188_vm0, %v796_v18  ;;  %675 = vmatprep.mubr.msk.bf16.mxu1 %vm188_vm0, %v805_v19 }
  0x35   :  { %262 = vmatmul.mubr.bf16.gmra.mxu0 %v798_v20  ;;  %294 = vmatmul.mubr.bf16.gmra.mxu1 %v807_v21 }
  0x36   :  { %672 = vmatprep.mubr.msk.bf16.mxu0 %vm188_vm0, %v802_v22  ;;  %676 = vmatprep.mubr.msk.bf16.mxu1 %vm188_vm0, %v808_v23 }
  0x3d   :  { %270 = vmatmul.mubr.bf16.gmra.mxu0 %v804_v24  ;;  %302 = vmatmul.mubr.bf16.gmra.mxu1 %v810_v25 }
  0xe5   :  { %v247_v26 = vpop.f32.mrf.mxu0  ;;  %v279_v27 = vpop.f32.mrf.mxu1 }
  0xe6   :  { %v935_v46 = vadd.f32 %v643_v40, %v247_v26  ;;  %v956_v9 = vadd.f32 %v643_v40, %v279_v27 }
  0xe7   :  { %v249_v28 = vpop.f32.mrf.mxu0  ;;  %v281_v29 = vpop.f32.mrf.mxu1 }
  0xe9   :  { %v250_v30 = vpop.f32.mrf.mxu0  ;;  %v282_v31 = vpop.f32.mrf.mxu1 }
  0xea   :  { %v933_v43 = vadd.f32 %v643_v40, %v250_v30  ;;  %v959_v11 = vadd.f32 %v643_v40, %v282_v31 }
  0xeb   :  { %v252_v32 = vpop.f32.mrf.mxu0  ;;  %v284_v33 = vpop.f32.mrf.mxu1 }
  0xec   :  { %v310_v50 = vadd.f32 %v933_v43, %v935_v46 }
  0xed   :  { %v255_v34 = vpop.f32.mrf.mxu0  ;;  %v287_v35 = vpop.f32.mrf.mxu1 }
  0xee   :  { %v937_v47 = vadd.f32 %v643_v40, %v255_v34  ;;  %v962_v13 = vadd.f32 %v643_v40, %v287_v35 }
  0xef   :  { %v257_v36 = vpop.f32.mrf.mxu0  ;;  %v289_v37 = vpop.f32.mrf.mxu1 }
  0xf0   :  { %v311_v54 = vadd.f32 %v310_v50, %v937_v47 }
  0xf1   :  { %v258_v38 = vpop.f32.mrf.mxu0  ;;  %v290_v39 = vpop.f32.mrf.mxu1 }
  0xf2   :  { %v941_v51 = vadd.f32 %v643_v40, %v258_v38  ;;  %v965_v15 = vadd.f32 %v643_v40, %v290_v39  ;;  %v361_v39 = vlaneseq }
  0xf3   :  { %v260_v41 = vpop.f32.mrf.mxu0  ;;  %v292_v42 = vpop.f32.mrf.mxu1 }
  0xf4   :  { %v312_v58 = vadd.f32 %v311_v54, %v941_v51 }
  0xf5   :  { %v263_v44 = vpop.f32.mrf.mxu0  ;;  %v295_v45 = vpop.f32.mrf.mxu1 }
  0xf6   :  { %v944_v55 = vadd.f32 %v643_v40, %v263_v44  ;;  %v968_v17 = vadd.f32 %v643_v40, %v295_v45 }
  0xf7   :  { %v265_v48 = vpop.f32.mrf.mxu0  ;;  %v297_v49 = vpop.f32.mrf.mxu1 }
  0xf8   :  { %v313_v62 = vadd.f32 %v312_v58, %v944_v55 }
  0xf9   :  { %v266_v52 = vpop.f32.mrf.mxu0  ;;  %v298_v53 = vpop.f32.mrf.mxu1 }
  0xfa   :  { %v947_v59 = vadd.f32 %v643_v40, %v266_v52  ;;  %v971_v19 = vadd.f32 %v643_v40, %v298_v53 }
  0xfb   :  { %v268_v56 = vpop.f32.mrf.mxu0  ;;  %v300_v57 = vpop.f32.mrf.mxu1 }
  0xfc   :  { %v314_v2 = vadd.f32 %v313_v62, %v947_v59 }
  0xfd   :  { %v271_v60 = vpop.f32.mrf.mxu0  ;;  %v303_v61 = vpop.f32.mrf.mxu1 }
  0xfe   :  { %v950_v63 = vadd.f32 %v643_v40, %v271_v60  ;;  %v975_v22 = vadd.f32 %v643_v40, %v303_v61 }
  0xff   :  { %v273_v0 = vpop.f32.mrf.mxu0  ;;  %v305_v1 = vpop.f32.mrf.mxu1 }
 0x100   :  { %v315_v5 = vadd.f32 %v314_v2, %v950_v63 }
 0x101   :  { %v274_v3 = vpop.f32.mrf.mxu0  ;;  %v306_v4 = vpop.f32.mrf.mxu1 }
 0x102   :  { %v954_v6 = vadd.f32 %v643_v40, %v274_v3  ;;  %v978_v24 = vadd.f32 %v643_v40, %v306_v4  ;;  %v362_v40 = vshrl.u32 %v361_v39, 7 }
 0x103   :  { %v276_v7 = vpop.f32.mrf.mxu0  ;;  %v308_v8 = vpop.f32.mrf.mxu1 }
 0x104   :  { %v316_v10 = vadd.f32 %v315_v5, %v954_v6  ;;  %v988_v45 = vsub.s32 0, %v362_v40 }
 0x106   :  { %v317_v12 = vadd.f32 %v316_v10, %v956_v9 }
 0x108   :  { %v318_v14 = vadd.f32 %v317_v12, %v959_v11 }
 0x10a   :  { %v319_v16 = vadd.f32 %v318_v14, %v962_v13 }
 0x10c   :  { %v320_v18 = vadd.f32 %v319_v16, %v965_v15 }
 0x10e   :  { %v321_v20 = vadd.f32 %v320_v18, %v968_v17 }
 0x110   :  { %v322_v21 = vadd.f32 %v321_v20, %v971_v19 }
 0x112   :  { %v323_v23 = vadd.f32 %v322_v21, %v975_v22 }
 0x114   :  { %v324_v25 = vadd.f32 %v323_v23, %v978_v24 }
 0x116   :  { %v325_v26 = vrot.slane %v324_v25, 4 }
 0x118   :  { %v326_v27 = vadd.f32 %v325_v26, %v324_v25 }
 0x11a   :  { %v327_v28 = vrot.slane %v326_v27, 2 }
 0x11c   :  { %v328_v29 = vadd.f32 %v327_v28, %v326_v27 }
 0x11e   :  { %v329_v30 = vrot.slane %v328_v29, 1 }
 0x120   :  { %v330_v31 = vadd.f32 %v329_v30, %v328_v29 }
 0x122   :  { %340 = vrot.lane.b32.xlu1 %v330_v31, %s814_s0  ;;  %332 = vrot.lane.b32.xlu0 %v330_v31, %s815_s2 }
 0x126   :  { %336 = vrot.lane.b32.xlu0 %v330_v31, %s816_s19 }
 0x194   :  { %v333_v32 = vpop.permute.xlu0 %332  ;;  %v341_v36 = vpop.permute.xlu1 %340 }
 0x195   :  { %v335_v33 = vadd.f32 %v333_v32, %v330_v31 }
 0x198   :  { %v337_v34 = vpop.permute.xlu0 %336 }
 0x199   :  { %v339_v35 = vadd.f32 %v337_v34, %v335_v33 }
 0x19b   :  { %v343_v37 = vadd.f32 %v341_v36, %v339_v35 }
 0x19d   :  { %v344_v38 = vmul.f32 0.001953125, %v343_v37 }
 0x19f   :  { %349 = vrot.lane.b32.xlu0 %v344_v38, %s816_s19  ;;  %346 = vrot.lane.b32.xlu1 %v344_v38, %s814_s0 }
 0x1a3   :  { %352 = vrot.lane.b32.xlu1 %v344_v38, %s815_s2 }
 0x211   :  { %v347_v41 = vpop.permute.xlu1 %346  ;;  %v350_v42 = vpop.permute.xlu0 %349 }
 0x212   :  { %v356_v44 = vsel %vm355_vm1, %v344_v38, %v347_v41  ;;  %v453_v38 = vld [vmem:[%s1157_s4] sm:$0x1] }
 0x213   :  { %v358_v48 = vsel %vm357_vm2, %v356_v44, %v350_v42  ;;  %v458_v39 = vrot.slane %v453_v38, %v988_v45 }
 0x215   :  { %v353_v49 = vpop.permute.xlu1 %352 }
 0x216   :  { %v360_v50 = vsel %vm359_vm3, %v358_v48, %v353_v49 }
 0x217   :  { %v364_v52 = vrot.slane %v360_v50, %v988_v45 }
 0x219   :  { %v994_v53 = vsub.f32 %v935_v46, %v364_v52  ;;  %v997_v54 = vsub.f32 %v933_v43, %v364_v52  ;;  %v1000_v56 = vsub.f32 %v937_v47, %v364_v52  ;;  %v1007_v60 = vsub.f32 %v941_v51, %v364_v52 }
 0x21a   :  { %v1010_v61 = vsub.f32 %v944_v55, %v364_v52  ;;  %v1015_v62 = vsub.f32 %v947_v59, %v364_v52  ;;  %v1020_v1 = vsub.f32 %v950_v63, %v364_v52  ;;  %v1025_v55 = vsub.f32 %v954_v6, %v364_v52 }
 0x21b   :  { %v381_v57 = vmul.f32 %v994_v53, %v994_v53  ;;  %v382_v58 = vmul.f32 %v997_v54, %v997_v54  ;;  %v383_v46 = vmul.f32 %v1000_v56, %v1000_v56  ;;  %v384_v47 = vmul.f32 %v1007_v60, %v1007_v60 }
 0x21c   :  { %v385_v51 = vmul.f32 %v1010_v61, %v1010_v61  ;;  %v386_v3 = vmul.f32 %v1015_v62, %v1015_v62  ;;  %v1030_v59 = vsub.f32 %v956_v9, %v364_v52  ;;  %v387_v5 = vmul.f32 %v1020_v1, %v1020_v1 }
 0x21d   :  { %v397_v43 = vadd.f32 %v382_v58, %v381_v57  ;;  %v1035_v63 = vsub.f32 %v959_v11, %v364_v52  ;;  %v388_v8 = vmul.f32 %v1025_v55, %v1025_v55  ;;  %v1040_v6 = vsub.f32 %v962_v13, %v364_v52  ;;  %v432_v57 = vld [vmem:[%s1158_s3] sm:$0x1] }
 0x21e   :  { %v389_v12 = vmul.f32 %v1030_v59, %v1030_v59  ;;  %v1045_v9 = vsub.f32 %v965_v15, %v364_v52  ;;  %v1050_v11 = vsub.f32 %v968_v17, %v364_v52  ;;  %v1055_v13 = vsub.f32 %v971_v19, %v364_v52 }
 0x21f   :  { %v398_v0 = vadd.f32 %v397_v43, %v383_v46  ;;  %v390_v16 = vmul.f32 %v1035_v63, %v1035_v63  ;;  %v391_v20 = vmul.f32 %v1040_v6, %v1040_v6  ;;  %v1060_v15 = vsub.f32 %v975_v22, %v364_v52 }
 0x220   :  { %v392_v23 = vmul.f32 %v1045_v9, %v1045_v9  ;;  %v393_v26 = vmul.f32 %v1050_v11, %v1050_v11  ;;  %v1065_v17 = vsub.f32 %v978_v24, %v364_v52  ;;  %v394_v28 = vmul.f32 %v1055_v13, %v1055_v13 }
 0x221   :  { %v399_v2 = vadd.f32 %v398_v0, %v384_v47  ;;  %v395_v19 = vmul.f32 %v1060_v15, %v1060_v15 }
 0x222   :  { %v396_v31 = vmul.f32 %v1065_v17, %v1065_v17 }
 0x223   :  { %v400_v4 = vadd.f32 %v399_v2, %v385_v51 }
 0x225   :  { %v401_v7 = vadd.f32 %v400_v4, %v386_v3 }
 0x227   :  { %v402_v10 = vadd.f32 %v401_v7, %v387_v5 }
 0x229   :  { %v403_v14 = vadd.f32 %v402_v10, %v388_v8 }
 0x22b   :  { %v404_v18 = vadd.f32 %v403_v14, %v389_v12 }
 0x22d   :  { %v405_v21 = vadd.f32 %v404_v18, %v390_v16 }
 0x22f   :  { %v406_v25 = vadd.f32 %v405_v21, %v391_v20 }
 0x231   :  { %v407_v27 = vadd.f32 %v406_v25, %v392_v23 }
 0x233   :  { %v408_v29 = vadd.f32 %v407_v27, %v393_v26 }
 0x235   :  { %v409_v30 = vadd.f32 %v408_v29, %v394_v28 }
 0x237   :  { %v410_v22 = vadd.f32 %v409_v30, %v395_v19 }
 0x239   :  { %v411_v32 = vadd.f32 %v410_v22, %v396_v31 }
 0x23b   :  { %v412_v33 = vrot.slane %v411_v32, 4 }
 0x23d   :  { %v413_v34 = vadd.f32 %v412_v33, %v411_v32 }
 0x23f   :  { %v414_v35 = vrot.slane %v413_v34, 2 }
 0x241   :  { %v415_v36 = vadd.f32 %v414_v35, %v413_v34 }
 0x243   :  { %v416_v37 = vrot.slane %v415_v36, 1 }
 0x245   :  { %v417_v24 = vadd.f32 %v416_v37, %v415_v36 }
 0x247   :  { %423 = vrot.lane.b32.xlu1 %v417_v24, %s816_s19  ;;  %419 = vrot.lane.b32.xlu0 %v417_v24, %s815_s2 }
 0x24b   :  { %427 = vrot.lane.b32.xlu0 %v417_v24, %s814_s0 }
 0x24f   :  { %459 = vrot.lane.b32.xlu0 %v458_v39, %s814_s0 }
 0x2b9   :  { %v420_v40 = vpop.permute.xlu0 %419  ;;  %v424_v42 = vpop.permute.xlu1 %423 }
 0x2ba   :  { %v422_v41 = vadd.f32 %v420_v40, %v417_v24 }
 0x2bc   :  { %v426_v44 = vadd.f32 %v424_v42, %v422_v41 }
 0x2bd   :  { %v428_v48 = vpop.permute.xlu0 %427 }
 0x2be   :  { %v430_v49 = vadd.f32 %v428_v48, %v426_v44 }
 0x2c0   :  { %v431_v50 = vmul.f32 0.001953125, %v430_v49 }
 0x2c1   :  { %v460_v47 = vpop.permute.xlu0 %459 }
 0x2c2   :  { %v433_v52 = vadd.f32 1e-05, %v431_v50  ;;  %v468_v12 = vsel %vm355_vm1, %v453_v38, %v460_v47 }
 0x2c4   :  { %811 = vrsqrt.f32 %v433_v52 }
 0x2d1   :  { %v812_v58 = vpop.eup %811 }
 0x2d2   :  { %v435_v46 = vmul.f32 %v812_v58, %v432_v57 }
 0x2d4   :  { %v440_v43 = vrot.slane %v435_v46, %v988_v45 }
 0x2d6   :  { %444 = vrot.lane.b32.xlu0 %v440_v43, %s816_s19  ;;  %441 = vrot.lane.b32.xlu1 %v440_v43, %s814_s0 }
 0x2da   :  { %447 = vrot.lane.b32.xlu1 %v440_v43, %s815_s2  ;;  %465 = vrot.lane.b32.xlu0 %v458_v39, %s815_s2 }
 0x2de   :  { %462 = vrot.lane.b32.xlu1 %v458_v39, %s816_s19 }
 0x348   :  { %v442_v0 = vpop.permute.xlu1 %441  ;;  %v445_v2 = vpop.permute.xlu0 %444 }
 0x349   :  { %v450_v51 = vsel %vm355_vm1, %v435_v46, %v442_v0 }
 0x34a   :  { %v451_v3 = vsel %vm357_vm2, %v450_v51, %v445_v2 }
 0x34c   :  { %v448_v4 = vpop.permute.xlu1 %447  ;;  %v466_v10 = vpop.permute.xlu0 %465 }
 0x34d   :  { %v452_v5 = vsel %vm359_vm3, %v451_v3, %v448_v4 }
 0x34e   :  { %v474_v7 = vrot.slane %v452_v5, %v988_v45 }
 0x350   :  { %v463_v8 = vpop.permute.xlu1 %462  ;;  %v475_v14 = vmul.f32 %v474_v7, %v994_v53  ;;  %v476_v16 = vmul.f32 %v474_v7, %v997_v54  ;;  %v477_v18 = vmul.f32 %v474_v7, %v1000_v56  ;;  %v478_v20 = vmul.f32 %v474_v7, %v1007_v60 }
 0x351   :  { %v479_v21 = vmul.f32 %v474_v7, %v1010_v61  ;;  %v480_v23 = vmul.f32 %v474_v7, %v1015_v62  ;;  %v469_v25 = vsel %vm357_vm2, %v468_v12, %v463_v8  ;;  %v481_v26 = vmul.f32 %v474_v7, %v1020_v1 }
 0x352   :  { %v482_v27 = vmul.f32 %v474_v7, %v1025_v55  ;;  %v483_v28 = vmul.f32 %v474_v7, %v1030_v59  ;;  %v470_v53 = vsel %vm359_vm3, %v469_v25, %v466_v10  ;;  %v484_v54 = vmul.f32 %v474_v7, %v1035_v63 }
 0x353   :  { %v485_v56 = vmul.f32 %v474_v7, %v1040_v6  ;;  %v486_v60 = vmul.f32 %v474_v7, %v1045_v9  ;;  %v494_v61 = vrot.slane %v470_v53, %v988_v45  ;;  %v487_v62 = vmul.f32 %v474_v7, %v1050_v11 }
 0x354   :  { %v488_v29 = vmul.f32 %v474_v7, %v1055_v13  ;;  %v489_v1 = vmul.f32 %v474_v7, %v1060_v15  ;;  %v490_v55 = vmul.f32 %v474_v7, %v1065_v17 }
 0x355   :  { %v495_v19 = vadd.f32 %v494_v61, %v475_v14  ;;  %v496_v59 = vadd.f32 %v494_v61, %v476_v16  ;;  %v497_v30 = vadd.f32 %v494_v61, %v477_v18  ;;  %v498_v31 = vadd.f32 %v494_v61, %v478_v20 }
 0x356   :  { %v499_v22 = vadd.f32 %v494_v61, %v479_v21  ;;  %v500_v63 = vadd.f32 %v494_v61, %v480_v23  ;;  %v501_v32 = vadd.f32 %v494_v61, %v481_v26  ;;  %v502_v6 = vadd.f32 %v494_v61, %v482_v27 }
 0x357   :  { %v503_v33 = vadd.f32 %v494_v61, %v483_v28  ;;  %v504_v9 = vadd.f32 %v494_v61, %v484_v54  ;;  %v505_v34 = vadd.f32 %v494_v61, %v485_v56  ;;  %v506_v45 = vadd.f32 %v494_v61, %v486_v60 }
 0x358   :  { %v507_v35 = vadd.f32 %v494_v61, %v487_v62  ;;  %v508_v11 = vadd.f32 %v494_v61, %v488_v29  ;;  %v509_v36 = vadd.f32 %v494_v61, %v489_v1  ;;  %v510_v13 = vadd.f32 %v494_v61, %v490_v55 }
 0x359   :  { %vm511_vm4 = vcmp.ge.f32.partialorder %v495_v19, 0.0  ;;  %vm512_vm5 = vcmp.ge.f32.partialorder %v496_v59, 0.0  ;;  %vm513_vm6 = vcmp.ge.f32.partialorder %v497_v30, 0.0  ;;  %vm514_vm7 = vcmp.ge.f32.partialorder %v498_v31, 0.0 }
 0x35a   :  { %vm515_vm8 = vcmp.ge.f32.partialorder %v499_v22, 0.0  ;;  %vm516_vm9 = vcmp.ge.f32.partialorder %v500_v63, 0.0  ;;  %vm517_vm10 = vcmp.ge.f32.partialorder %v501_v32, 0.0  ;;  %vm518_vm11 = vcmp.ge.f32.partialorder %v502_v6, 0.0 }
 0x35b   :  { %vm519_vm12 = vcmp.ge.f32.partialorder %v503_v33, 0.0  ;;  %vm520_vm13 = vcmp.ge.f32.partialorder %v504_v9, 0.0  ;;  %vm521_vm14 = vcmp.ge.f32.partialorder %v505_v34, 0.0  ;;  %vm522_vm15 = vcmp.ge.f32.partialorder %v506_v45, 0.0 }
 0x35c   :  { %vm523_vm0 = vcmp.ge.f32.partialorder %v507_v35, 0.0  ;;  %vm524_vm1 = vcmp.ge.f32.partialorder %v508_v11, 0.0  ;;  %vm525_vm2 = vcmp.ge.f32.partialorder %v509_v36, 0.0  ;;  %vm526_vm3 = vcmp.ge.f32.partialorder %v510_v13, 0.0 }
 0x35d   :  { %v527_v15 = vmul.f32 0.01, %v495_v19  ;;  %v528_v17 = vmul.f32 0.01, %v496_v59  ;;  %v529_v37 = vmul.f32 0.01, %v497_v30 }
 0x35e   :  { %v530_v24 = vmul.f32 0.01, %v498_v31  ;;  %v531_v38 = vmul.f32 0.01, %v499_v22  ;;  %v532_v39 = vmul.f32 0.01, %v500_v63 }
 0x35f   :  { %v533_v40 = vmul.f32 0.01, %v501_v32  ;;  %v534_v41 = vmul.f32 0.01, %v502_v6  ;;  %v535_v42 = vmul.f32 0.01, %v503_v33  ;;  %v543_v44 = vsel %vm511_vm4, %v495_v19, %v527_v15 }
 0x360   :  { %v536_v48 = vmul.f32 0.01, %v504_v9  ;;  %v537_v49 = vmul.f32 0.01, %v505_v34  ;;  %v538_v50 = vmul.f32 0.01, %v506_v45  ;;  %v544_v52 = vsel %vm512_vm5, %v496_v59, %v528_v17 }
 0x361   :  { %v539_v57 = vmul.f32 0.01, %v507_v35  ;;  %v540_v58 = vmul.f32 0.01, %v508_v11  ;;  %v541_v46 = vmul.f32 0.01, %v509_v36  ;;  %v545_v43 = vsel %vm513_vm6, %v497_v30, %v529_v37 }
 0x362   :  { %v542_v47 = vmul.f32 0.01, %v510_v13  ;;  %v546_v0 = vsel %vm514_vm7, %v498_v31, %v530_v24  ;;  %v547_v51 = vsel %vm515_vm8, %v499_v22, %v531_v38  ;;  %v548_v2 = vsel %vm516_vm9, %v500_v63, %v532_v39 }
 0x363   :  { %v549_v3 = vsel %vm517_vm10, %v501_v32, %v533_v40  ;;  %v550_v4 = vsel %vm518_vm11, %v502_v6, %v534_v41  ;;  %v551_v5 = vsel %vm519_vm12, %v503_v33, %v535_v42  ;;  %v552_v7 = vsel %vm520_vm13, %v504_v9, %v536_v48 }
 0x364   :  { %v553_v8 = vsel %vm521_vm14, %v505_v34, %v537_v49  ;;  %v554_v10 = vsel %vm522_vm15, %v506_v45, %v538_v50  ;;  %v555_v12 = vsel %vm523_vm0, %v507_v35, %v539_v57  ;;  %v556_v14 = vsel %vm524_vm1, %v508_v11, %v540_v58 }
 0x365   :  { %v557_v16 = vsel %vm525_vm2, %v509_v36, %v541_v46  ;;  %v558_v18 = vsel %vm526_vm3, %v510_v13, %v542_v47  ;;  %v712_v20 = vpack.c.bf16 %v544_v52, %v543_v44  ;;  %v717_v21 = vpack.c.bf16 %v546_v0, %v545_v43 }
 0x366   :  { %v722_v23 = vpack.c.bf16 %v548_v2, %v547_v51  ;;  %v727_v25 = vpack.c.bf16 %v550_v4, %v549_v3  ;;  %v732_v26 = vpack.c.bf16 %v552_v7, %v551_v5  ;;  %v737_v27 = vpack.c.bf16 %v554_v10, %v553_v8 }
 0x367   :  { %713 = vst [vmem:[%s1159_s5] sm:$0xff] %v712_v20   ;;  %749 = vst [vmem:[%s1159_s5 + $0x8] sm:$0xff] %v717_v21   ;;  %v742_v28 = vpack.c.bf16 %v556_v14, %v555_v12  ;;  %v747_v53 = vpack.c.bf16 %v558_v18, %v557_v16 }
 0x368   :  { %750 = vst [vmem:[%s1159_s5 + $0x10] sm:$0xff] %v722_v23   ;;  %751 = vst [vmem:[%s1159_s5 + $0x18] sm:$0xff] %v727_v25  }
 0x369   :  { %752 = vst [vmem:[%s1159_s5 + $0x20] sm:$0xff] %v732_v26   ;;  %753 = vst [vmem:[%s1159_s5 + $0x28] sm:$0xff] %v737_v27  }
 0x36a   :  { %754 = vst [vmem:[%s1159_s5 + $0x30] sm:$0xff] %v742_v28   ;;  %755 = vst [vmem:[%s1159_s5 + $0x38] sm:$0xff] %v747_v53  }

// kernel: forward.9
= control target key start
LH: loop header
LB: loop body
LE: loop exit
PB: predicated region body
PF: predicated region fallthrough
CT: control target
= control target key end

     0   :  { %vm379_vm0 = vcmask 1043456   ;;  %vm282_vm1 = vcmask 588800   ;;  %s1586_s1 = inlined_call_operand.vmem [shape: bf16[72,128], index: 1, kind: input, shape index: {}]   ;;  %s1587_s0 = inlined_call_operand.vmem [shape: bf16[512,72], index: 0, kind: input, shape index: {}]   ;;  %s1588_s2 = inlined_call_operand.vmem [shape: f32[1,128], index: 2, kind: input, shape index: {}]   ;;  %s1589_s3 = inlined_call_operand.vmem [shape: f32[512,128], index: 3, kind: output, shape index: {}]  }
   0x1   :  { %v997_v0 = vld [vmem:[%s1586_s1 + $0x20] ss:$0 sps:$4 sm:$0xff]   ;;  %v998_v1 = vld [vmem:[%s1586_s1 + $0x18] sm:$0xff]   ;;  %v999_v3 = vld [vmem:[%s1586_s1 + $0x10] sm:$0xff]  }
   0x2   :  { %995 = vmatprep.subr.msk.bf16.mxu0 %vm379_vm0, %v997_v0  ;;  %996 = vmatprep.subr.msk.bf16.mxu1 %vm379_vm0, %v997_v0  ;;  %v381_v2 = vsel %vm379_vm0, %v997_v0, 0  ;;  %v1002_v4 = vld [vmem:[%s1587_s0] sm:$0xff]   ;;  %v1000_v6 = vld [vmem:[%s1586_s1 + $0x8] sm:$0xff]   ;;  %v1006_v10 = vld [vmem:[%s1587_s0 + $0x10] sm:$0xff]  }
   0x3   :  { %912 = vmatpush3.bf16.msra.mxu0 %v381_v2  ;;  %990 = vmatpush3.bf16.msra.mxu1 %v381_v2  ;;  %v1003_v5 = vld [vmem:[%s1587_s0 + $0x80] sm:$0xff]   ;;  %v1004_v8 = vld [vmem:[%s1587_s0 + $0x8] sm:$0xff]   ;;  %v1007_v11 = vld [vmem:[%s1587_s0 + $0x90] sm:$0xff]  }
   0x4   :  { %913 = vmatprep.subr.bf16.mxu0 %v998_v1  ;;  %986 = vmatprep.subr.bf16.mxu1 %v998_v1  ;;  %v1001_v7 = vld [vmem:[%s1586_s1] sm:$0xff]   ;;  %v1005_v9 = vld [vmem:[%s1587_s0 + $0x88] sm:$0xff]   ;;  %v1008_v12 = vld [vmem:[%s1587_s0 + $0x18] sm:$0xff]  }
   0x5   :  { %921 = vmatprep.mubr.msk.bf16.mxu0 %vm282_vm1, %v1002_v4  ;;  %953 = vmatprep.mubr.msk.bf16.mxu1 %vm282_vm1, %v1003_v5  ;;  %v1009_v13 = vld [vmem:[%s1587_s0 + $0x98] sm:$0xff]   ;;  %v1010_v14 = vld [vmem:[%s1587_s0 + $0x20] sm:$0xff]   ;;  %v1012_v16 = vld [vmem:[%s1587_s0 + $0x28] sm:$0xff]  }
   0x6   :  { %v1011_v15 = vld [vmem:[%s1587_s0 + $0xa0] sm:$0xff]   ;;  %v1013_v17 = vld [vmem:[%s1587_s0 + $0xa8] sm:$0xff]   ;;  %v1014_v18 = vld [vmem:[%s1587_s0 + $0x30] sm:$0xff]  }
   0x7   :  { %914 = vmatpush3.bf16.msra.mxu0 %v998_v1  ;;  %991 = vmatpush3.bf16.msra.mxu1 %v998_v1  ;;  %v1015_v19 = vld [vmem:[%s1587_s0 + $0xb0] sm:$0xff]   ;;  %v1016_v20 = vld [vmem:[%s1587_s0 + $0x38] sm:$0xff]   ;;  %v1018_v22 = vld [vmem:[%s1587_s0 + $0x40] sm:$0xff]  }
   0x8   :  { %915 = vmatprep.subr.bf16.mxu0 %v999_v3  ;;  %987 = vmatprep.subr.bf16.mxu1 %v999_v3  ;;  %v1017_v21 = vld [vmem:[%s1587_s0 + $0xb8] sm:$0xff]   ;;  %v1019_v23 = vld [vmem:[%s1587_s0 + $0xc0] sm:$0xff]   ;;  %v1020_v24 = vld [vmem:[%s1587_s0 + $0x48] sm:$0xff]  }
   0x9   :  { %v1021_v25 = vld [vmem:[%s1587_s0 + $0xc8] sm:$0xff]   ;;  %v1022_v26 = vld [vmem:[%s1587_s0 + $0x50] sm:$0xff]   ;;  %v1024_v28 = vld [vmem:[%s1587_s0 + $0x58] sm:$0xff]  }
   0xa   :  { %v1023_v27 = vld [vmem:[%s1587_s0 + $0xd0] sm:$0xff]   ;;  %v1025_v29 = vld [vmem:[%s1587_s0 + $0xd8] sm:$0xff]   ;;  %v1026_v30 = vld [vmem:[%s1587_s0 + $0x60] sm:$0xff]  }
   0xb   :  { %916 = vmatpush3.bf16.msra.mxu0 %v999_v3  ;;  %992 = vmatpush3.bf16.msra.mxu1 %v999_v3  ;;  %v1027_v31 = vld [vmem:[%s1587_s0 + $0xe0] sm:$0xff]   ;;  %v1028_v32 = vld [vmem:[%s1587_s0 + $0x68] sm:$0xff]   ;;  %v1030_v34 = vld [vmem:[%s1587_s0 + $0x70] sm:$0xff]  }
   0xc   :  { %917 = vmatprep.subr.bf16.mxu0 %v1000_v6  ;;  %988 = vmatprep.subr.bf16.mxu1 %v1000_v6  ;;  %v1029_v33 = vld [vmem:[%s1587_s0 + $0xe8] sm:$0xff]   ;;  %v1031_v35 = vld [vmem:[%s1587_s0 + $0xf0] sm:$0xff]   ;;  %v1032_v36 = vld [vmem:[%s1587_s0 + $0x78] sm:$0xff]  }
   0xd   :  { %v1033_v37 = vld [vmem:[%s1587_s0 + $0xf8] sm:$0xff]   ;;  %v1328_v38 = vld [vmem:[%s1588_s2] ss:$0 sm:$0xff] }
   0xf   :  { %918 = vmatpush3.bf16.msra.mxu0 %v1000_v6  ;;  %993 = vmatpush3.bf16.msra.mxu1 %v1000_v6 }
  0x10   :  { %919 = vmatprep.subr.bf16.mxu0 %v1001_v7  ;;  %989 = vmatprep.subr.bf16.mxu1 %v1001_v7 }
  0x13   :  { %920 = vmatpush3.bf16.msra.mxu0 %v1001_v7  ;;  %994 = vmatpush3.bf16.msra.mxu1 %v1001_v7 }
  0x16   :  { %922 = vmatmul.mubr.msk.bf16.vlgmr.msra.gmra.mxu0 %vm282_vm1, %v1004_v8  ;;  %954 = vmatmul.mubr.msk.bf16.vlgmr.msra.gmra.mxu1 %vm282_vm1, %v1005_v9 }
  0x17   :  { %925 = vmatprep.mubr.msk.bf16.mxu0 %vm282_vm1, %v1006_v10  ;;  %957 = vmatprep.mubr.msk.bf16.mxu1 %vm282_vm1, %v1007_v11 }
  0x1e   :  { %926 = vmatmul.mubr.msk.bf16.gmra.mxu0 %vm282_vm1, %v1008_v12  ;;  %958 = vmatmul.mubr.msk.bf16.gmra.mxu1 %vm282_vm1, %v1009_v13 }
  0x1f   :  { %929 = vmatprep.mubr.msk.bf16.mxu0 %vm282_vm1, %v1010_v14  ;;  %961 = vmatprep.mubr.msk.bf16.mxu1 %vm282_vm1, %v1011_v15 }
  0x26   :  { %930 = vmatmul.mubr.msk.bf16.gmra.mxu0 %vm282_vm1, %v1012_v16  ;;  %962 = vmatmul.mubr.msk.bf16.gmra.mxu1 %vm282_vm1, %v1013_v17 }
  0x27   :  { %933 = vmatprep.mubr.msk.bf16.mxu0 %vm282_vm1, %v1014_v18  ;;  %965 = vmatprep.mubr.msk.bf16.mxu1 %vm282_vm1, %v1015_v19 }
  0x2e   :  { %934 = vmatmul.mubr.msk.bf16.gmra.mxu0 %vm282_vm1, %v1016_v20  ;;  %966 = vmatmul.mubr.msk.bf16.gmra.mxu1 %vm282_vm1, %v1017_v21 }
  0x2f   :  { %937 = vmatprep.mubr.msk.bf16.mxu0 %vm282_vm1, %v1018_v22  ;;  %969 = vmatprep.mubr.msk.bf16.mxu1 %vm282_vm1, %v1019_v23 }
  0x36   :  { %938 = vmatmul.mubr.msk.bf16.gmra.mxu0 %vm282_vm1, %v1020_v24  ;;  %970 = vmatmul.mubr.msk.bf16.gmra.mxu1 %vm282_vm1, %v1021_v25 }
  0x37   :  { %941 = vmatprep.mubr.msk.bf16.mxu0 %vm282_vm1, %v1022_v26  ;;  %973 = vmatprep.mubr.msk.bf16.mxu1 %vm282_vm1, %v1023_v27 }
  0x3e   :  { %942 = vmatmul.mubr.msk.bf16.gmra.mxu0 %vm282_vm1, %v1024_v28  ;;  %974 = vmatmul.mubr.msk.bf16.gmra.mxu1 %vm282_vm1, %v1025_v29 }
  0x3f   :  { %945 = vmatprep.mubr.msk.bf16.mxu0 %vm282_vm1, %v1026_v30  ;;  %977 = vmatprep.mubr.msk.bf16.mxu1 %vm282_vm1, %v1027_v31 }
  0x46   :  { %946 = vmatmul.mubr.msk.bf16.gmra.mxu0 %vm282_vm1, %v1028_v32  ;;  %978 = vmatmul.mubr.msk.bf16.gmra.mxu1 %vm282_vm1, %v1029_v33 }
  0x47   :  { %949 = vmatprep.mubr.msk.bf16.mxu0 %vm282_vm1, %v1030_v34  ;;  %981 = vmatprep.mubr.msk.bf16.mxu1 %vm282_vm1, %v1031_v35 }
  0x4e   :  { %950 = vmatmul.mubr.msk.bf16.gmra.mxu0 %vm282_vm1, %v1032_v36  ;;  %982 = vmatmul.mubr.msk.bf16.gmra.mxu1 %vm282_vm1, %v1033_v37 }
  0xd6   :  { %v923_v39 = vpop.f32.mrf.mxu0  ;;  %v955_v40 = vpop.f32.mrf.mxu1 }
  0xd7   :  { %v426_v41 = vadd.f32 %v923_v39, %v1328_v38  ;;  %v554_v42 = vadd.f32 %v955_v40, %v1328_v38 }
  0xd8   :  { %v417_v43 = vpop.f32.mrf.mxu0  ;;  %v545_v44 = vpop.f32.mrf.mxu1 }
  0xd9   :  { %1034 = vtanh.f32 %v426_v41  ;;  %v418_v45 = vadd.f32 %v1328_v38, %v417_v43  ;;  %v546_v46 = vadd.f32 %v1328_v38, %v545_v44 }
  0xda   :  { %1036 = vtanh.f32 %v554_v42  ;;  %v924_v47 = vpop.f32.mrf.mxu0  ;;  %v956_v48 = vpop.f32.mrf.mxu1 }
  0xdb   :  { %1038 = vtanh.f32 %v418_v45  ;;  %v429_v49 = vadd.f32 %v924_v47, %v1328_v38  ;;  %v557_v50 = vadd.f32 %v956_v48, %v1328_v38 }
  0xdc   :  { %1040 = vtanh.f32 %v546_v46  ;;  %v420_v51 = vpop.f32.mrf.mxu0  ;;  %v548_v52 = vpop.f32.mrf.mxu1 }
  0xdd   :  { %1042 = vtanh.f32 %v429_v49  ;;  %v421_v53 = vadd.f32 %v1328_v38, %v420_v51  ;;  %v549_v54 = vadd.f32 %v1328_v38, %v548_v52 }
  0xde   :  { %1044 = vtanh.f32 %v557_v50  ;;  %v927_v55 = vpop.f32.mrf.mxu0  ;;  %v959_v56 = vpop.f32.mrf.mxu1 }
  0xdf   :  { %1046 = vtanh.f32 %v421_v53  ;;  %v442_v57 = vadd.f32 %v927_v55, %v1328_v38  ;;  %v570_v58 = vadd.f32 %v959_v56, %v1328_v38 }
  0xe0   :  { %1048 = vtanh.f32 %v549_v54  ;;  %v433_v59 = vpop.f32.mrf.mxu0  ;;  %v561_v60 = vpop.f32.mrf.mxu1 }
  0xe1   :  { %1050 = vtanh.f32 %v442_v57  ;;  %v434_v61 = vadd.f32 %v1328_v38, %v433_v59  ;;  %v562_v62 = vadd.f32 %v1328_v38, %v561_v60 }
  0xe2   :  { %1052 = vtanh.f32 %v570_v58  ;;  %v928_v63 = vpop.f32.mrf.mxu0  ;;  %v960_v0 = vpop.f32.mrf.mxu1 }
  0xe3   :  { %1054 = vtanh.f32 %v434_v61  ;;  %v445_v1 = vadd.f32 %v928_v63, %v1328_v38  ;;  %v573_v2 = vadd.f32 %v960_v0, %v1328_v38 }
  0xe4   :  { %1056 = vtanh.f32 %v562_v62  ;;  %v436_v3 = vpop.f32.mrf.mxu0  ;;  %v564_v4 = vpop.f32.mrf.mxu1 }
  0xe5   :  { %1058 = vtanh.f32 %v445_v1  ;;  %v437_v5 = vadd.f32 %v1328_v38, %v436_v3  ;;  %v565_v6 = vadd.f32 %v1328_v38, %v564_v4 }
  0xe6   :  { %v1035_v7 = vpop.eup %1034  ;;  %1060 = vtanh.f32 %v573_v2  ;;  %v931_v8 = vpop.f32.mrf.mxu0 }
  0xe7   :  { %v963_v9 = vpop.f32.mrf.mxu1  ;;  %v1037_v10 = vpop.eup %1036  ;;  %738 = vst [vmem:[%s1589_s3 + $0x10] sm:$0xff] %v1035_v7  ;;  %1062 = vtanh.f32 %v437_v5  ;;  %v458_v11 = vadd.f32 %v931_v8, %v1328_v38 }
  0xe8   :  { %v586_v12 = vadd.f32 %v963_v9, %v1328_v38  ;;  %v1039_v13 = vpop.eup %1038  ;;  %770 = vst [vmem:[%s1589_s3 + $0x110] sm:$0xff] %v1037_v10  ;;  %1064 = vtanh.f32 %v565_v6  ;;  %v449_v14 = vpop.f32.mrf.mxu0 }
  0xe9   :  { %v577_v15 = vpop.f32.mrf.mxu1  ;;  %v1041_v16 = vpop.eup %1040  ;;  %736 = vst [vmem:[%s1589_s3] sm:$0xff] %v1039_v13  ;;  %1066 = vtanh.f32 %v458_v11  ;;  %v450_v17 = vadd.f32 %v1328_v38, %v449_v14 }
  0xea   :  { %v578_v18 = vadd.f32 %v1328_v38, %v577_v15  ;;  %v1043_v19 = vpop.eup %1042  ;;  %768 = vst [vmem:[%s1589_s3 + $0x100] sm:$0xff] %v1041_v16  ;;  %1068 = vtanh.f32 %v586_v12  ;;  %v932_v20 = vpop.f32.mrf.mxu0 }
  0xeb   :  { %v964_v21 = vpop.f32.mrf.mxu1  ;;  %v1045_v22 = vpop.eup %1044  ;;  %739 = vst [vmem:[%s1589_s3 + $0x18] sm:$0xff] %v1043_v19  ;;  %1070 = vtanh.f32 %v450_v17  ;;  %v461_v23 = vadd.f32 %v932_v20, %v1328_v38 }
  0xec   :  { %v589_v24 = vadd.f32 %v964_v21, %v1328_v38  ;;  %v1047_v25 = vpop.eup %1046  ;;  %771 = vst [vmem:[%s1589_s3 + $0x118] sm:$0xff] %v1045_v22  ;;  %1072 = vtanh.f32 %v578_v18  ;;  %v452_v26 = vpop.f32.mrf.mxu0 }
  0xed   :  { %v580_v27 = vpop.f32.mrf.mxu1  ;;  %v1049_v28 = vpop.eup %1048  ;;  %737 = vst [vmem:[%s1589_s3 + $0x8] sm:$0xff] %v1047_v25  ;;  %1074 = vtanh.f32 %v461_v23  ;;  %v453_v29 = vadd.f32 %v1328_v38, %v452_v26 }
  0xee   :  { %v581_v30 = vadd.f32 %v1328_v38, %v580_v27  ;;  %v1051_v31 = vpop.eup %1050  ;;  %769 = vst [vmem:[%s1589_s3 + $0x108] sm:$0xff] %v1049_v28  ;;  %1076 = vtanh.f32 %v589_v24  ;;  %v935_v32 = vpop.f32.mrf.mxu0 }
  0xef   :  { %v967_v33 = vpop.f32.mrf.mxu1  ;;  %v1053_v34 = vpop.eup %1052  ;;  %742 = vst [vmem:[%s1589_s3 + $0x30] sm:$0xff] %v1051_v31  ;;  %1078 = vtanh.f32 %v453_v29  ;;  %v474_v35 = vadd.f32 %v935_v32, %v1328_v38 }
  0xf0   :  { %v602_v36 = vadd.f32 %v967_v33, %v1328_v38  ;;  %v1055_v37 = vpop.eup %1054  ;;  %774 = vst [vmem:[%s1589_s3 + $0x130] sm:$0xff] %v1053_v34  ;;  %1080 = vtanh.f32 %v581_v30  ;;  %v465_v39 = vpop.f32.mrf.mxu0 }
  0xf1   :  { %v593_v40 = vpop.f32.mrf.mxu1  ;;  %v1057_v41 = vpop.eup %1056  ;;  %740 = vst [vmem:[%s1589_s3 + $0x20] sm:$0xff] %v1055_v37  ;;  %1082 = vtanh.f32 %v474_v35  ;;  %v466_v42 = vadd.f32 %v1328_v38, %v465_v39 }
  0xf2   :  { %v594_v43 = vadd.f32 %v1328_v38, %v593_v40  ;;  %v1059_v44 = vpop.eup %1058  ;;  %772 = vst [vmem:[%s1589_s3 + $0x120] sm:$0xff] %v1057_v41  ;;  %1084 = vtanh.f32 %v602_v36  ;;  %v936_v45 = vpop.f32.mrf.mxu0 }
  0xf3   :  { %v968_v46 = vpop.f32.mrf.mxu1  ;;  %v1061_v47 = vpop.eup %1060  ;;  %743 = vst [vmem:[%s1589_s3 + $0x38] sm:$0xff] %v1059_v44  ;;  %1086 = vtanh.f32 %v466_v42  ;;  %v477_v48 = vadd.f32 %v936_v45, %v1328_v38 }
  0xf4   :  { %v605_v49 = vadd.f32 %v968_v46, %v1328_v38  ;;  %v1063_v50 = vpop.eup %1062  ;;  %775 = vst [vmem:[%s1589_s3 + $0x138] sm:$0xff] %v1061_v47  ;;  %1088 = vtanh.f32 %v594_v43  ;;  %v468_v51 = vpop.f32.mrf.mxu0 }
  0xf5   :  { %v596_v52 = vpop.f32.mrf.mxu1  ;;  %v1065_v53 = vpop.eup %1064  ;;  %741 = vst [vmem:[%s1589_s3 + $0x28] sm:$0xff] %v1063_v50  ;;  %1090 = vtanh.f32 %v477_v48  ;;  %v469_v54 = vadd.f32 %v1328_v38, %v468_v51 }
  0xf6   :  { %v597_v55 = vadd.f32 %v1328_v38, %v596_v52  ;;  %v1067_v56 = vpop.eup %1066  ;;  %773 = vst [vmem:[%s1589_s3 + $0x128] sm:$0xff] %v1065_v53  ;;  %1092 = vtanh.f32 %v605_v49  ;;  %v939_v57 = vpop.f32.mrf.mxu0 }
  0xf7   :  { %v971_v58 = vpop.f32.mrf.mxu1  ;;  %v1069_v59 = vpop.eup %1068  ;;  %746 = vst [vmem:[%s1589_s3 + $0x50] sm:$0xff] %v1067_v56  ;;  %1094 = vtanh.f32 %v469_v54  ;;  %v490_v60 = vadd.f32 %v939_v57, %v1328_v38 }
  0xf8   :  { %v618_v61 = vadd.f32 %v971_v58, %v1328_v38  ;;  %v1071_v62 = vpop.eup %1070  ;;  %778 = vst [vmem:[%s1589_s3 + $0x150] sm:$0xff] %v1069_v59  ;;  %1096 = vtanh.f32 %v597_v55  ;;  %v481_v63 = vpop.f32.mrf.mxu0 }
  0xf9   :  { %v609_v0 = vpop.f32.mrf.mxu1  ;;  %v1073_v1 = vpop.eup %1072  ;;  %744 = vst [vmem:[%s1589_s3 + $0x40] sm:$0xff] %v1071_v62  ;;  %1098 = vtanh.f32 %v490_v60  ;;  %v482_v2 = vadd.f32 %v1328_v38, %v481_v63 }
  0xfa   :  { %v610_v3 = vadd.f32 %v1328_v38, %v609_v0  ;;  %v1075_v4 = vpop.eup %1074  ;;  %776 = vst [vmem:[%s1589_s3 + $0x140] sm:$0xff] %v1073_v1  ;;  %1100 = vtanh.f32 %v618_v61  ;;  %v940_v5 = vpop.f32.mrf.mxu0 }
  0xfb   :  { %v972_v6 = vpop.f32.mrf.mxu1  ;;  %v1077_v7 = vpop.eup %1076  ;;  %747 = vst [vmem:[%s1589_s3 + $0x58] sm:$0xff] %v1075_v4  ;;  %1102 = vtanh.f32 %v482_v2  ;;  %v493_v8 = vadd.f32 %v940_v5, %v1328_v38 }
  0xfc   :  { %v621_v9 = vadd.f32 %v972_v6, %v1328_v38  ;;  %v1079_v10 = vpop.eup %1078  ;;  %779 = vst [vmem:[%s1589_s3 + $0x158] sm:$0xff] %v1077_v7  ;;  %1104 = vtanh.f32 %v610_v3  ;;  %v484_v11 = vpop.f32.mrf.mxu0 }
  0xfd   :  { %v612_v12 = vpop.f32.mrf.mxu1  ;;  %v1081_v13 = vpop.eup %1080  ;;  %745 = vst [vmem:[%s1589_s3 + $0x48] sm:$0xff] %v1079_v10  ;;  %1106 = vtanh.f32 %v493_v8  ;;  %v485_v14 = vadd.f32 %v1328_v38, %v484_v11 }
  0xfe   :  { %v613_v15 = vadd.f32 %v1328_v38, %v612_v12  ;;  %v1083_v16 = vpop.eup %1082  ;;  %777 = vst [vmem:[%s1589_s3 + $0x148] sm:$0xff] %v1081_v13  ;;  %1108 = vtanh.f32 %v621_v9  ;;  %v943_v17 = vpop.f32.mrf.mxu0 }
  0xff   :  { %v975_v18 = vpop.f32.mrf.mxu1  ;;  %v1085_v19 = vpop.eup %1084  ;;  %750 = vst [vmem:[%s1589_s3 + $0x70] sm:$0xff] %v1083_v16  ;;  %1110 = vtanh.f32 %v485_v14  ;;  %v506_v20 = vadd.f32 %v943_v17, %v1328_v38 }
 0x100   :  { %v634_v21 = vadd.f32 %v975_v18, %v1328_v38  ;;  %v1087_v22 = vpop.eup %1086  ;;  %782 = vst [vmem:[%s1589_s3 + $0x170] sm:$0xff] %v1085_v19  ;;  %1112 = vtanh.f32 %v613_v15  ;;  %v497_v23 = vpop.f32.mrf.mxu0 }
 0x101   :  { %v625_v24 = vpop.f32.mrf.mxu1  ;;  %v1089_v25 = vpop.eup %1088  ;;  %748 = vst [vmem:[%s1589_s3 + $0x60] sm:$0xff] %v1087_v22  ;;  %1114 = vtanh.f32 %v506_v20  ;;  %v498_v26 = vadd.f32 %v1328_v38, %v497_v23 }
 0x102   :  { %v626_v27 = vadd.f32 %v1328_v38, %v625_v24  ;;  %v1091_v28 = vpop.eup %1090  ;;  %780 = vst [vmem:[%s1589_s3 + $0x160] sm:$0xff] %v1089_v25  ;;  %1116 = vtanh.f32 %v634_v21  ;;  %v944_v29 = vpop.f32.mrf.mxu0 }
 0x103   :  { %v976_v30 = vpop.f32.mrf.mxu1  ;;  %v1093_v31 = vpop.eup %1092  ;;  %751 = vst [vmem:[%s1589_s3 + $0x78] sm:$0xff] %v1091_v28  ;;  %1118 = vtanh.f32 %v498_v26  ;;  %v509_v32 = vadd.f32 %v944_v29, %v1328_v38 }
 0x104   :  { %v637_v33 = vadd.f32 %v976_v30, %v1328_v38  ;;  %v1095_v34 = vpop.eup %1094  ;;  %783 = vst [vmem:[%s1589_s3 + $0x178] sm:$0xff] %v1093_v31  ;;  %1120 = vtanh.f32 %v626_v27  ;;  %v500_v35 = vpop.f32.mrf.mxu0 }
 0x105   :  { %v628_v36 = vpop.f32.mrf.mxu1  ;;  %v1097_v37 = vpop.eup %1096  ;;  %749 = vst [vmem:[%s1589_s3 + $0x68] sm:$0xff] %v1095_v34  ;;  %1122 = vtanh.f32 %v509_v32  ;;  %v501_v39 = vadd.f32 %v1328_v38, %v500_v35 }
 0x106   :  { %v629_v40 = vadd.f32 %v1328_v38, %v628_v36  ;;  %v1099_v41 = vpop.eup %1098  ;;  %781 = vst [vmem:[%s1589_s3 + $0x168] sm:$0xff] %v1097_v37  ;;  %1124 = vtanh.f32 %v637_v33  ;;  %v947_v42 = vpop.f32.mrf.mxu0 }
 0x107   :  { %v979_v43 = vpop.f32.mrf.mxu1  ;;  %v1101_v44 = vpop.eup %1100  ;;  %754 = vst [vmem:[%s1589_s3 + $0x90] sm:$0xff] %v1099_v41  ;;  %1126 = vtanh.f32 %v501_v39  ;;  %v522_v45 = vadd.f32 %v947_v42, %v1328_v38 }
 0x108   :  { %v650_v46 = vadd.f32 %v979_v43, %v1328_v38  ;;  %v1103_v47 = vpop.eup %1102  ;;  %786 = vst [vmem:[%s1589_s3 + $0x190] sm:$0xff] %v1101_v44  ;;  %1128 = vtanh.f32 %v629_v40  ;;  %v513_v48 = vpop.f32.mrf.mxu0 }
 0x109   :  { %v641_v49 = vpop.f32.mrf.mxu1  ;;  %v1105_v50 = vpop.eup %1104  ;;  %752 = vst [vmem:[%s1589_s3 + $0x80] sm:$0xff] %v1103_v47  ;;  %1130 = vtanh.f32 %v522_v45  ;;  %v514_v51 = vadd.f32 %v1328_v38, %v513_v48 }
 0x10a   :  { %v642_v52 = vadd.f32 %v1328_v38, %v641_v49  ;;  %v1107_v53 = vpop.eup %1106  ;;  %784 = vst [vmem:[%s1589_s3 + $0x180] sm:$0xff] %v1105_v50  ;;  %1132 = vtanh.f32 %v650_v46  ;;  %v948_v54 = vpop.f32.mrf.mxu0 }
 0x10b   :  { %v980_v55 = vpop.f32.mrf.mxu1  ;;  %v1109_v56 = vpop.eup %1108  ;;  %755 = vst [vmem:[%s1589_s3 + $0x98] sm:$0xff] %v1107_v53  ;;  %1134 = vtanh.f32 %v514_v51  ;;  %v525_v57 = vadd.f32 %v948_v54, %v1328_v38 }
 0x10c   :  { %v653_v58 = vadd.f32 %v980_v55, %v1328_v38  ;;  %v1111_v59 = vpop.eup %1110  ;;  %787 = vst [vmem:[%s1589_s3 + $0x198] sm:$0xff] %v1109_v56  ;;  %1136 = vtanh.f32 %v642_v52  ;;  %v516_v60 = vpop.f32.mrf.mxu0 }
 0x10d   :  { %v644_v61 = vpop.f32.mrf.mxu1  ;;  %v1113_v62 = vpop.eup %1112  ;;  %753 = vst [vmem:[%s1589_s3 + $0x88] sm:$0xff] %v1111_v59  ;;  %1138 = vtanh.f32 %v525_v57  ;;  %v517_v63 = vadd.f32 %v1328_v38, %v516_v60 }
 0x10e   :  { %v645_v0 = vadd.f32 %v1328_v38, %v644_v61  ;;  %v1115_v1 = vpop.eup %1114  ;;  %785 = vst [vmem:[%s1589_s3 + $0x188] sm:$0xff] %v1113_v62  ;;  %1140 = vtanh.f32 %v653_v58  ;;  %v951_v2 = vpop.f32.mrf.mxu0 }
 0x10f   :  { %v983_v3 = vpop.f32.mrf.mxu1  ;;  %v1117_v4 = vpop.eup %1116  ;;  %758 = vst [vmem:[%s1589_s3 + $0xb0] sm:$0xff] %v1115_v1  ;;  %1142 = vtanh.f32 %v517_v63  ;;  %v538_v5 = vadd.f32 %v951_v2, %v1328_v38 }
 0x110   :  { %v666_v6 = vadd.f32 %v983_v3, %v1328_v38  ;;  %v1119_v7 = vpop.eup %1118  ;;  %790 = vst [vmem:[%s1589_s3 + $0x1b0] sm:$0xff] %v1117_v4  ;;  %1144 = vtanh.f32 %v645_v0  ;;  %v529_v8 = vpop.f32.mrf.mxu0 }
 0x111   :  { %v657_v9 = vpop.f32.mrf.mxu1  ;;  %v1121_v10 = vpop.eup %1120  ;;  %756 = vst [vmem:[%s1589_s3 + $0xa0] sm:$0xff] %v1119_v7  ;;  %1146 = vtanh.f32 %v538_v5  ;;  %v530_v11 = vadd.f32 %v1328_v38, %v529_v8 }
 0x112   :  { %v658_v12 = vadd.f32 %v1328_v38, %v657_v9  ;;  %v1123_v13 = vpop.eup %1122  ;;  %788 = vst [vmem:[%s1589_s3 + $0x1a0] sm:$0xff] %v1121_v10  ;;  %1148 = vtanh.f32 %v666_v6  ;;  %v952_v14 = vpop.f32.mrf.mxu0 }
 0x113   :  { %v984_v15 = vpop.f32.mrf.mxu1  ;;  %v1125_v16 = vpop.eup %1124  ;;  %759 = vst [vmem:[%s1589_s3 + $0xb8] sm:$0xff] %v1123_v13  ;;  %1150 = vtanh.f32 %v530_v11  ;;  %v541_v17 = vadd.f32 %v952_v14, %v1328_v38 }
 0x114   :  { %v669_v18 = vadd.f32 %v984_v15, %v1328_v38  ;;  %v1127_v19 = vpop.eup %1126  ;;  %791 = vst [vmem:[%s1589_s3 + $0x1b8] sm:$0xff] %v1125_v16  ;;  %1152 = vtanh.f32 %v658_v12  ;;  %v532_v20 = vpop.f32.mrf.mxu0 }
 0x115   :  { %v660_v21 = vpop.f32.mrf.mxu1  ;;  %v1129_v22 = vpop.eup %1128  ;;  %757 = vst [vmem:[%s1589_s3 + $0xa8] sm:$0xff] %v1127_v19  ;;  %1154 = vtanh.f32 %v541_v17  ;;  %v533_v23 = vadd.f32 %v1328_v38, %v532_v20 }
 0x116   :  { %v661_v24 = vadd.f32 %v1328_v38, %v660_v21  ;;  %v1131_v25 = vpop.eup %1130  ;;  %789 = vst [vmem:[%s1589_s3 + $0x1a8] sm:$0xff] %v1129_v22  ;;  %1156 = vtanh.f32 %v669_v18 }
 0x117   :  { %v1133_v26 = vpop.eup %1132  ;;  %762 = vst [vmem:[%s1589_s3 + $0xd0] sm:$0xff] %v1131_v25  ;;  %1158 = vtanh.f32 %v533_v23 }
 0x118   :  { %v1135_v27 = vpop.eup %1134  ;;  %794 = vst [vmem:[%s1589_s3 + $0x1d0] sm:$0xff] %v1133_v26  ;;  %1160 = vtanh.f32 %v661_v24 }
 0x119   :  { %v1137_v28 = vpop.eup %1136  ;;  %760 = vst [vmem:[%s1589_s3 + $0xc0] sm:$0xff] %v1135_v27 }
 0x11a   :  { %v1139_v38 = vpop.eup %1138  ;;  %792 = vst [vmem:[%s1589_s3 + $0x1c0] sm:$0xff] %v1137_v28 }
 0x11b   :  { %v1141_v29 = vpop.eup %1140  ;;  %763 = vst [vmem:[%s1589_s3 + $0xd8] sm:$0xff] %v1139_v38 }
 0x11c   :  { %v1143_v30 = vpop.eup %1142  ;;  %795 = vst [vmem:[%s1589_s3 + $0x1d8] sm:$0xff] %v1141_v29 }
 0x11d   :  { %v1145_v31 = vpop.eup %1144  ;;  %761 = vst [vmem:[%s1589_s3 + $0xc8] sm:$0xff] %v1143_v30 }
 0x11e   :  { %v1147_v32 = vpop.eup %1146  ;;  %793 = vst [vmem:[%s1589_s3 + $0x1c8] sm:$0xff] %v1145_v31 }
 0x11f   :  { %v1149_v33 = vpop.eup %1148  ;;  %766 = vst [vmem:[%s1589_s3 + $0xf0] sm:$0xff] %v1147_v32 }
 0x120   :  { %v1151_v34 = vpop.eup %1150  ;;  %798 = vst [vmem:[%s1589_s3 + $0x1f0] sm:$0xff] %v1149_v33 }
 0x121   :  { %v1153_v35 = vpop.eup %1152  ;;  %764 = vst [vmem:[%s1589_s3 + $0xe0] sm:$0xff] %v1151_v34 }
 0x122   :  { %v1155_v36 = vpop.eup %1154  ;;  %796 = vst [vmem:[%s1589_s3 + $0x1e0] sm:$0xff] %v1153_v35 }
 0x123   :  { %v1157_v37 = vpop.eup %1156  ;;  %767 = vst [vmem:[%s1589_s3 + $0xf8] sm:$0xff] %v1155_v36 }
 0x124   :  { %v1159_v39 = vpop.eup %1158  ;;  %799 = vst [vmem:[%s1589_s3 + $0x1f8] sm:$0xff] %v1157_v37 }
 0x125   :  { %v1161_v40 = vpop.eup %1160  ;;  %765 = vst [vmem:[%s1589_s3 + $0xe8] sm:$0xff] %v1159_v39 }
 0x126   :  { %797 = vst [vmem:[%s1589_s3 + $0x1e8] sm:$0xff] %v1161_v40 }

</bundles_post_ra>
